<compile_context>
chip_gen: v7x
topology: tpu7x:2x2x1
jax: 0.10.0
libtpu: 0.0.40
codegen_flags: <defaults>
</compile_context>

<pallas_src>
import jax
import jax.numpy as jnp
from jax.experimental import pallas as pl
from jax.experimental.pallas import tpu as pltpu


# ----------------------------------------------------------------------------
# Fused kernel: the whole DilatedBlocks stack for one image, lane-dense.
# ----------------------------------------------------------------------------
def _make_fused_kernel(H, W, Cin, Cmid, dilations):
    nblk = len(dilations)

    def kernel(x_ref, w1_ref, w2_ref, w3_ref,
               s1_ref, b1_ref, s2_ref, b2_ref, s3_ref, b3_ref, o_ref):
        # Row (y) index, used only to mask the wrapped sublanes of the dy rolls.
        row_y = jax.lax.broadcasted_iota(jnp.int32, (H, 1), 0)

        cur = x_ref[0]                                   # (H, W*Cin), f32

        # TODO(synk): at nblk > ~4 switch this static unroll to lax.fori_loop
        # over blocks (dynamic weight indexing + dynamic-shift rolls).
        for blk in range(nblk):
            d = dilations[blk]

            # ---- conv1: 1x1 (Cin->Cmid) as block-diag matmul + BN + ReLU --
            h1 = jnp.dot(cur.astype(jnp.bfloat16), w1_ref[blk],
                         preferred_element_type=jnp.float32)
            h1 = jnp.maximum(h1 * s1_ref[blk] + b1_ref[blk], 0.0)
            h1b = h1.astype(jnp.bfloat16)                # (H, W*Cmid)

            # ---- conv2: 3x3 dilated (Cmid->Cmid) + BN + ReLU --------------
            # kx taps + x edge padding are inside the banded weight; only the
            # dy row shift remains: XLU roll + one row-validity select per
            # off-centre ky.  acc starts from the unshifted centre row (ky=1).
            acc = None
            for ky in (1, 0, 2):
                dy = (ky - 1) * d
                if abs(dy) >= H:                 # whole tap row out of bounds
                    continue
                p = jnp.dot(h1b, w2_ref[blk, ky],
                            preferred_element_type=jnp.float32)  # (H, W*Cmid)
                if dy != 0:
                    # p[y] <- p[y + dy]; wrapped rows masked to zero.
                    p = pltpu.roll(p, (-dy) % H, axis=0)
                    if dy > 0:
                        p = jnp.where(row_y < H - dy, p, 0.0)
                    else:
                        p = jnp.where(row_y >= -dy, p, 0.0)
                acc = p if acc is None else acc + p
            h2 = jnp.maximum(acc * s2_ref[blk] + b2_ref[blk], 0.0)

            # ---- conv3: 1x1 (Cmid->Cin) block-diag + BN + ReLU, residual --
            h3 = jnp.dot(h2.astype(jnp.bfloat16), w3_ref[blk],
                         preferred_element_type=jnp.float32)
            h3 = jnp.maximum(h3 * s3_ref[blk] + b3_ref[blk], 0.0)
            cur = cur + h3

        o_ref[0] = cur                                   # dense 512-lane store

    return kernel


# ----------------------------------------------------------------------------
# Host-side weight transforms (lane-dense block-diag / banded forms).
# ----------------------------------------------------------------------------
def _block_diag_w(w, W):
    # w: (Ci, Co) -> (W*Ci, W*Co) block-diagonal (one w block per x column).
    eye = jnp.eye(W, dtype=w.dtype)
    return jnp.einsum('xy,io->xiyo', eye, w).reshape(W * w.shape[0],
                                                     W * w.shape[1])


def _banded_w2(w2, W, d):
    # w2: (3, 3, Cmid, Cmid) HWIO -> (3, W*Cmid, W*Cmid): one banded matrix
    # per ky.  The kx taps and the left/right zero padding are encoded by
    # sel[x_in, x_out] = 1 iff x_in == x_out + (kx-1)*d (absent => zero pad).
    Cmid = w2.shape[2]
    xs = jnp.arange(W)
    mats = []
    for ky in range(3):
        m = jnp.zeros((W, Cmid, W, Cmid), w2.dtype)
        for kx in range(3):
            dx = (kx - 1) * d
            sel = (xs[:, None] == (xs[None, :] + dx)).astype(w2.dtype)
            m = m + jnp.einsum('pq,io->piqo', sel, w2[ky, kx])
        mats.append(m.reshape(W * Cmid, W * Cmid))
    return jnp.stack(mats)


def _tile_lane(v, W):
    # (1, C) per-channel scale/bias -> (1, W*C): lane x*C+c reads v[c].
    return jnp.tile(v.reshape(-1), W).reshape(1, -1)


def _vmem_limit_bytes():
    # Generation-aware scoped-VMEM limit: ~100 MiB on 128-MiB parts
    # (v5e/v6e), 48 MiB (safe headroom) on 64-MiB v7x or when unknown.
    try:
        cap = pltpu.get_tpu_info().vmem_capacity_bytes
    except Exception:
        cap = None
    if cap is not None and cap >= 100 * 1024 * 1024:
        return 100 * 1024 * 1024
    return 48 * 1024 * 1024


# ----------------------------------------------------------------------------
# Wrapper.
# ----------------------------------------------------------------------------
def dilated_blocks_pallas(x_nchw, params_list, dilations):
    """DilatedBlocks.forward: fused sequential DilatedBottleneck blocks.

    x_nchw: (B, Cin, H, W) float32 (PyTorch layout).  Returns the same layout.
    """
    B, Cin, H, W = x_nchw.shape
    Cmid = params_list[0]["w1"].shape[1]
    nblk = len(params_list)
    assert len(dilations) == nblk
    # Small-shape lane-dense path: the XLU roll needs (8,128)-aligned tiles.
    assert H % 8 == 0 and (W * Cmid) % 128 == 0, (H, W, Cmid)

    # NCHW -> NHWC -> lane-dense (B, H, W*Cin).
    x = jnp.transpose(x_nchw, (0, 2, 3, 1)).reshape(B, H, W * Cin)

    W1 = jnp.stack([_block_diag_w(p["w1"], W)
                    for p in params_list]).astype(jnp.bfloat16)
    W2 = jnp.stack([_banded_w2(p["w2"], W, d)
                    for p, d in zip(params_list, dilations)]).astype(jnp.bfloat16)
    W3 = jnp.stack([_block_diag_w(p["w3"], W)
                    for p in params_list]).astype(jnp.bfloat16)
    S1 = jnp.stack([_tile_lane(p["s1"], W) for p in params_list])
    B1 = jnp.stack([_tile_lane(p["b1"], W) for p in params_list])
    S2 = jnp.stack([_tile_lane(p["s2"], W) for p in params_list])
    B2 = jnp.stack([_tile_lane(p["b2"], W) for p in params_list])
    S3 = jnp.stack([_tile_lane(p["s3"], W) for p in params_list])
    B3 = jnp.stack([_tile_lane(p["b3"], W) for p in params_list])
    weights = [W1, W2, W3, S1, B1, S2, B2, S3, B3]

    in_specs = [pl.BlockSpec((1, H, W * Cin), lambda b: (b, 0, 0))]
    for a in weights:
        # Grid-invariant operands (constant index map); at production sizes
        # consider pipeline_mode=pl.Buffered(1) to avoid double-buffering.
        in_specs.append(pl.BlockSpec(a.shape, lambda b, _n=a.ndim: (0,) * _n))

    kernel = _make_fused_kernel(H, W, Cin, Cmid, tuple(dilations))

    out = pl.pallas_call(
        kernel,
        out_shape=jax.ShapeDtypeStruct((B, H, W * Cin), jnp.float32),
        grid_spec=pltpu.PrefetchScalarGridSpec(
            num_scalar_prefetch=0,
            grid=(B,),                       # one image per step; feeds both
            in_specs=in_specs,               # v7x TensorCores at B >= 2.
            out_specs=pl.BlockSpec((1, H, W * Cin), lambda b: (b, 0, 0)),
        ),
        compiler_params=pltpu.CompilerParams(
            dimension_semantics=("parallel",),
            vmem_limit_bytes=_vmem_limit_bytes()),
    )(x, *weights)

    return jnp.transpose(out.reshape(B, H, W, Cin), (0, 3, 1, 2))


# ----------------------------------------------------------------------------
# Deterministic parameter init (eval-mode BN folded into scale/bias).
# ----------------------------------------------------------------------------
def _init_block_params(key, Cin, Cmid, eps=1e-5):
    ks = jax.random.split(key, 15)

    def folded_bn(kg, kb, km, kv, C):
        gamma = jax.random.uniform(kg, (C,), jnp.float32, 0.5, 1.5)
        beta = 0.1 * jax.random.normal(kb, (C,), jnp.float32)
        mean = 0.1 * jax.random.normal(km, (C,), jnp.float32)
        var = jax.random.uniform(kv, (C,), jnp.float32, 0.5, 1.5)
        s = gamma / jnp.sqrt(var + eps)
        b = beta - mean * s
        return s.reshape(1, C), b.reshape(1, C)

    w1 = 0.1 * jax.random.normal(ks[0], (Cin, Cmid), jnp.float32)         # 1x1
    s1, b1 = folded_bn(ks[1], ks[2], ks[3], ks[4], Cmid)
    w2 = 0.1 * jax.random.normal(ks[5], (3, 3, Cmid, Cmid), jnp.float32)  # HWIO
    s2, b2 = folded_bn(ks[6], ks[7], ks[8], ks[9], Cmid)
    w3 = 0.1 * jax.random.normal(ks[10], (Cmid, Cin), jnp.float32)        # 1x1
    s3, b3 = folded_bn(ks[11], ks[12], ks[13], ks[14], Cin)
    return dict(w1=w1, s1=s1, b1=b1, w2=w2, s2=s2, b2=b2,
                w3=w3, s3=s3, b3=b3)


# ----------------------------------------------------------------------------
# Pure-JAX f32 reference (lax conv) for correctness checking.
# ----------------------------------------------------------------------------
def _block_ref(x_nhwc, p, dilation):
    def cbr(y, w_hwio, s, b, dil, pad):
        y = jax.lax.conv_general_dilated(
            y, w_hwio, window_strides=(1, 1),
            padding=[(pad, pad), (pad, pad)],
            rhs_dilation=(dil, dil),
            dimension_numbers=("NHWC", "HWIO", "NHWC"))
        return jnp.maximum(y * s.reshape(1, 1, 1, -1)
                           + b.reshape(1, 1, 1, -1), 0.0)

    Cin, Cmid = p["w1"].shape
    out = cbr(x_nhwc, p["w1"].reshape(1, 1, Cin, Cmid), p["s1"], p["b1"], 1, 0)
    out = cbr(out, p["w2"], p["s2"], p["b2"], dilation, dilation)
    out = cbr(out, p["w3"].reshape(1, 1, Cmid, Cin), p["s3"], p["b3"], 1, 0)
    return out + x_nhwc


def dilated_blocks_ref(x_nchw, params_list, dilations):
    x = jnp.transpose(x_nchw, (0, 2, 3, 1))
    for p, d in zip(params_list, dilations):
        x = _block_ref(x, p, d)
    return jnp.transpose(x, (0, 3, 1, 2))


if __name__ == "__main__":
    # Small synthetic config consistent with DilatedBlocks(in, mid, [4, 8]).
    B, Cin, Cmid, H, W = 2, 32, 8, 16, 16
    dilations = [4, 8]

    key = jax.random.PRNGKey(0)
    kx0, k1, k2 = jax.random.split(key, 3)
    x_nchw = jax.random.normal(kx0, (B, Cin, H, W), jnp.float32)  # NCHW
    params_list = [_init_block_params(k1, Cin, Cmid),
                   _init_block_params(k2, Cin, Cmid)]

    out = jax.block_until_ready(
        dilated_blocks_pallas(x_nchw, params_list, dilations))
    ref = jax.block_until_ready(
        dilated_blocks_ref(x_nchw, params_list, dilations))

    assert out.shape == (B, Cin, H, W)
    max_err = float(jnp.max(jnp.abs(out - ref)))
    # bf16 MXU operands with f32 accumulation -> loosened tolerance vs f32 ref.
    assert jnp.allclose(out, ref, atol=2e-2, rtol=2e-2), max_err
    print("KERNEL_OK")
</pallas_src>

<mosaic_0001>
module attributes {stable_mosaic.version = 11 : i64} {
  func.func @kernel(%arg0: i32, %arg1: memref<1x16x512xf32, #tpu.memory_space<vmem>>, %arg2: memref<2x512x128xbf16, #tpu.memory_space<vmem>>, %arg3: memref<2x3x128x128xbf16, #tpu.memory_space<vmem>>, %arg4: memref<2x128x512xbf16, #tpu.memory_space<vmem>>, %arg5: memref<2x1x128xf32, #tpu.memory_space<vmem>>, %arg6: memref<2x1x128xf32, #tpu.memory_space<vmem>>, %arg7: memref<2x1x128xf32, #tpu.memory_space<vmem>>, %arg8: memref<2x1x128xf32, #tpu.memory_space<vmem>>, %arg9: memref<2x1x512xf32, #tpu.memory_space<vmem>>, %arg10: memref<2x1x512xf32, #tpu.memory_space<vmem>>, %arg11: memref<1x16x512xf32, #tpu.memory_space<vmem>>) attributes {dimension_semantics = [#tpu.dimension_semantics<parallel>], iteration_bounds = array<i64: 2>, scalar_prefetch = 0 : i64, scratch_operands = 0 : i64, tpu.core_type = #tpu.core_type<tc>, window_params = [{transform_indices = @transform_0, window_bounds = array<i64: 1, 16, 512>}, {pipeline_mode = #tpu.pipeline_mode<synchronous>, transform_indices = @transform_1, window_bounds = array<i64: 2, 512, 128>}, {pipeline_mode = #tpu.pipeline_mode<synchronous>, transform_indices = @transform_2, window_bounds = array<i64: 2, 3, 128, 128>}, {pipeline_mode = #tpu.pipeline_mode<synchronous>, transform_indices = @transform_3, window_bounds = array<i64: 2, 128, 512>}, {pipeline_mode = #tpu.pipeline_mode<synchronous>, transform_indices = @transform_4, window_bounds = array<i64: 2, 1, 128>}, {pipeline_mode = #tpu.pipeline_mode<synchronous>, transform_indices = @transform_5, window_bounds = array<i64: 2, 1, 128>}, {pipeline_mode = #tpu.pipeline_mode<synchronous>, transform_indices = @transform_6, window_bounds = array<i64: 2, 1, 128>}, {pipeline_mode = #tpu.pipeline_mode<synchronous>, transform_indices = @transform_7, window_bounds = array<i64: 2, 1, 128>}, {pipeline_mode = #tpu.pipeline_mode<synchronous>, transform_indices = @transform_8, window_bounds = array<i64: 2, 1, 512>}, {pipeline_mode = #tpu.pipeline_mode<synchronous>, transform_indices = @transform_9, window_bounds = array<i64: 2, 1, 512>}, {transform_indices = @transform_10, window_bounds = array<i64: 1, 16, 512>}]} {
    %0 = tpu.iota {dimensions = array<i32: 0>} : vector<16x1xi32>
    %c0 = arith.constant 0 : index
    %c0_0 = arith.constant 0 : index
    %c0_1 = arith.constant 0 : index
    %1 = vector.load %arg1[%c0, %c0_0, %c0_1] : memref<1x16x512xf32, #tpu.memory_space<vmem>>, vector<1x16x512xf32>
    %2 = vector.shape_cast %1 : vector<1x16x512xf32> to vector<16x512xf32>
    %3 = arith.truncf %2 : vector<16x512xf32> to vector<16x512xbf16>
    %c0_2 = arith.constant 0 : index
    %c0_3 = arith.constant 0 : index
    %c0_4 = arith.constant 0 : index
    %4 = vector.load %arg2[%c0_2, %c0_3, %c0_4] : memref<2x512x128xbf16, #tpu.memory_space<vmem>>, vector<1x512x128xbf16>
    %5 = vector.shape_cast %4 : vector<1x512x128xbf16> to vector<512x128xbf16>
    %cst = arith.constant dense<0.000000e+00> : vector<16x128xf32>
    %6 = tpu.matmul %3, %5, %cst {dimension_numbers = #tpu.dot_dimension_numbers<[1], [0], [0], [1], [0, 0, 1, 1], [], []>} : vector<16x512xbf16>, vector<512x128xbf16>, vector<16x128xf32> -> vector<16x128xf32>
    %c0_5 = arith.constant 0 : index
    %c0_6 = arith.constant 0 : index
    %c0_7 = arith.constant 0 : index
    %7 = vector.load %arg5[%c0_5, %c0_6, %c0_7] : memref<2x1x128xf32, #tpu.memory_space<vmem>>, vector<1x1x128xf32>
    %8 = vector.shape_cast %7 : vector<1x1x128xf32> to vector<1x128xf32>
    %9 = vector.broadcast %8 : vector<1x128xf32> to vector<16x128xf32>
    %10 = arith.mulf %6, %9 : vector<16x128xf32>
    %c0_8 = arith.constant 0 : index
    %c0_9 = arith.constant 0 : index
    %c0_10 = arith.constant 0 : index
    %11 = vector.load %arg6[%c0_8, %c0_9, %c0_10] : memref<2x1x128xf32, #tpu.memory_space<vmem>>, vector<1x1x128xf32>
    %12 = vector.shape_cast %11 : vector<1x1x128xf32> to vector<1x128xf32>
    %13 = vector.broadcast %12 : vector<1x128xf32> to vector<16x128xf32>
    %14 = arith.addf %10, %13 : vector<16x128xf32>
    %cst_11 = arith.constant 0.000000e+00 : f32
    %15 = vector.broadcast %cst_11 : f32 to vector<16x128xf32>
    %16 = arith.maximumf %14, %15 : vector<16x128xf32>
    %17 = arith.truncf %16 : vector<16x128xf32> to vector<16x128xbf16>
    %c0_12 = arith.constant 0 : index
    %c1 = arith.constant 1 : index
    %c0_13 = arith.constant 0 : index
    %c0_14 = arith.constant 0 : index
    %18 = vector.load %arg3[%c0_12, %c1, %c0_13, %c0_14] : memref<2x3x128x128xbf16, #tpu.memory_space<vmem>>, vector<1x1x128x128xbf16>
    %19 = vector.shape_cast %18 : vector<1x1x128x128xbf16> to vector<128x128xbf16>
    %cst_15 = arith.constant dense<0.000000e+00> : vector<16x128xf32>
    %20 = tpu.matmul %17, %19, %cst_15 {dimension_numbers = #tpu.dot_dimension_numbers<[1], [0], [0], [1], [0, 0, 1, 1], [], []>} : vector<16x128xbf16>, vector<128x128xbf16>, vector<16x128xf32> -> vector<16x128xf32>
    %c0_16 = arith.constant 0 : index
    %c0_17 = arith.constant 0 : index
    %c0_18 = arith.constant 0 : index
    %c0_19 = arith.constant 0 : index
    %21 = vector.load %arg3[%c0_16, %c0_17, %c0_18, %c0_19] : memref<2x3x128x128xbf16, #tpu.memory_space<vmem>>, vector<1x1x128x128xbf16>
    %22 = vector.shape_cast %21 : vector<1x1x128x128xbf16> to vector<128x128xbf16>
    %cst_20 = arith.constant dense<0.000000e+00> : vector<16x128xf32>
    %23 = tpu.matmul %17, %22, %cst_20 {dimension_numbers = #tpu.dot_dimension_numbers<[1], [0], [0], [1], [0, 0, 1, 1], [], []>} : vector<16x128xbf16>, vector<128x128xbf16>, vector<16x128xf32> -> vector<16x128xf32>
    %c4_i32 = arith.constant 4 : i32
    %24 = tpu.dynamic_rotate %23 by %c4_i32 dim 0 : vector<16x128xf32>, i32 -> vector<16x128xf32>
    %c4_i32_21 = arith.constant 4 : i32
    %25 = vector.broadcast %c4_i32_21 : i32 to vector<16x1xi32>
    %26 = arith.cmpi sge, %0, %25 : vector<16x1xi32>
    %cst_22 = arith.constant 0.000000e+00 : f32
    %27 = vector.shape_cast %26 : vector<16x1xi1> to vector<16x1xi1>
    %28 = vector.broadcast %27 : vector<16x1xi1> to vector<16x128xi1>
    %29 = vector.broadcast %cst_22 : f32 to vector<16x128xf32>
    %30 = arith.select %28, %24, %29 : vector<16x128xi1>, vector<16x128xf32>
    %31 = arith.addf %20, %30 : vector<16x128xf32>
    %c0_23 = arith.constant 0 : index
    %c2 = arith.constant 2 : index
    %c0_24 = arith.constant 0 : index
    %c0_25 = arith.constant 0 : index
    %32 = vector.load %arg3[%c0_23, %c2, %c0_24, %c0_25] : memref<2x3x128x128xbf16, #tpu.memory_space<vmem>>, vector<1x1x128x128xbf16>
    %33 = vector.shape_cast %32 : vector<1x1x128x128xbf16> to vector<128x128xbf16>
    %cst_26 = arith.constant dense<0.000000e+00> : vector<16x128xf32>
    %34 = tpu.matmul %17, %33, %cst_26 {dimension_numbers = #tpu.dot_dimension_numbers<[1], [0], [0], [1], [0, 0, 1, 1], [], []>} : vector<16x128xbf16>, vector<128x128xbf16>, vector<16x128xf32> -> vector<16x128xf32>
    %c12_i32 = arith.constant 12 : i32
    %35 = tpu.dynamic_rotate %34 by %c12_i32 dim 0 : vector<16x128xf32>, i32 -> vector<16x128xf32>
    %c12_i32_27 = arith.constant 12 : i32
    %36 = vector.broadcast %c12_i32_27 : i32 to vector<16x1xi32>
    %37 = arith.cmpi slt, %0, %36 : vector<16x1xi32>
    %cst_28 = arith.constant 0.000000e+00 : f32
    %38 = vector.shape_cast %37 : vector<16x1xi1> to vector<16x1xi1>
    %39 = vector.broadcast %38 : vector<16x1xi1> to vector<16x128xi1>
    %40 = vector.broadcast %cst_28 : f32 to vector<16x128xf32>
    %41 = arith.select %39, %35, %40 : vector<16x128xi1>, vector<16x128xf32>
    %42 = arith.addf %31, %41 : vector<16x128xf32>
    %c0_29 = arith.constant 0 : index
    %c0_30 = arith.constant 0 : index
    %c0_31 = arith.constant 0 : index
    %43 = vector.load %arg7[%c0_29, %c0_30, %c0_31] : memref<2x1x128xf32, #tpu.memory_space<vmem>>, vector<1x1x128xf32>
    %44 = vector.shape_cast %43 : vector<1x1x128xf32> to vector<1x128xf32>
    %45 = vector.broadcast %44 : vector<1x128xf32> to vector<16x128xf32>
    %46 = arith.mulf %42, %45 : vector<16x128xf32>
    %c0_32 = arith.constant 0 : index
    %c0_33 = arith.constant 0 : index
    %c0_34 = arith.constant 0 : index
    %47 = vector.load %arg8[%c0_32, %c0_33, %c0_34] : memref<2x1x128xf32, #tpu.memory_space<vmem>>, vector<1x1x128xf32>
    %48 = vector.shape_cast %47 : vector<1x1x128xf32> to vector<1x128xf32>
    %49 = vector.broadcast %48 : vector<1x128xf32> to vector<16x128xf32>
    %50 = arith.addf %46, %49 : vector<16x128xf32>
    %cst_35 = arith.constant 0.000000e+00 : f32
    %51 = vector.broadcast %cst_35 : f32 to vector<16x128xf32>
    %52 = arith.maximumf %50, %51 : vector<16x128xf32>
    %53 = arith.truncf %52 : vector<16x128xf32> to vector<16x128xbf16>
    %c0_36 = arith.constant 0 : index
    %c0_37 = arith.constant 0 : index
    %c0_38 = arith.constant 0 : index
    %54 = vector.load %arg4[%c0_36, %c0_37, %c0_38] : memref<2x128x512xbf16, #tpu.memory_space<vmem>>, vector<1x128x512xbf16>
    %55 = vector.shape_cast %54 : vector<1x128x512xbf16> to vector<128x512xbf16>
    %cst_39 = arith.constant dense<0.000000e+00> : vector<16x512xf32>
    %56 = tpu.matmul %53, %55, %cst_39 {dimension_numbers = #tpu.dot_dimension_numbers<[1], [0], [0], [1], [0, 0, 1, 1], [], []>} : vector<16x128xbf16>, vector<128x512xbf16>, vector<16x512xf32> -> vector<16x512xf32>
    %c0_40 = arith.constant 0 : index
    %c0_41 = arith.constant 0 : index
    %c0_42 = arith.constant 0 : index
    %57 = vector.load %arg9[%c0_40, %c0_41, %c0_42] : memref<2x1x512xf32, #tpu.memory_space<vmem>>, vector<1x1x512xf32>
    %58 = vector.shape_cast %57 : vector<1x1x512xf32> to vector<1x512xf32>
    %59 = vector.broadcast %58 : vector<1x512xf32> to vector<16x512xf32>
    %60 = arith.mulf %56, %59 : vector<16x512xf32>
    %c0_43 = arith.constant 0 : index
    %c0_44 = arith.constant 0 : index
    %c0_45 = arith.constant 0 : index
    %61 = vector.load %arg10[%c0_43, %c0_44, %c0_45] : memref<2x1x512xf32, #tpu.memory_space<vmem>>, vector<1x1x512xf32>
    %62 = vector.shape_cast %61 : vector<1x1x512xf32> to vector<1x512xf32>
    %63 = vector.broadcast %62 : vector<1x512xf32> to vector<16x512xf32>
    %64 = arith.addf %60, %63 : vector<16x512xf32>
    %cst_46 = arith.constant 0.000000e+00 : f32
    %65 = vector.broadcast %cst_46 : f32 to vector<16x512xf32>
    %66 = arith.maximumf %64, %65 : vector<16x512xf32>
    %67 = arith.addf %2, %66 : vector<16x512xf32>
    %68 = arith.truncf %67 : vector<16x512xf32> to vector<16x512xbf16>
    %c1_47 = arith.constant 1 : index
    %c0_48 = arith.constant 0 : index
    %c0_49 = arith.constant 0 : index
    %69 = vector.load %arg2[%c1_47, %c0_48, %c0_49] : memref<2x512x128xbf16, #tpu.memory_space<vmem>>, vector<1x512x128xbf16>
    %70 = vector.shape_cast %69 : vector<1x512x128xbf16> to vector<512x128xbf16>
    %cst_50 = arith.constant dense<0.000000e+00> : vector<16x128xf32>
    %71 = tpu.matmul %68, %70, %cst_50 {dimension_numbers = #tpu.dot_dimension_numbers<[1], [0], [0], [1], [0, 0, 1, 1], [], []>} : vector<16x512xbf16>, vector<512x128xbf16>, vector<16x128xf32> -> vector<16x128xf32>
    %c1_51 = arith.constant 1 : index
    %c0_52 = arith.constant 0 : index
    %c0_53 = arith.constant 0 : index
    %72 = vector.load %arg5[%c1_51, %c0_52, %c0_53] : memref<2x1x128xf32, #tpu.memory_space<vmem>>, vector<1x1x128xf32>
    %73 = vector.shape_cast %72 : vector<1x1x128xf32> to vector<1x128xf32>
    %74 = vector.broadcast %73 : vector<1x128xf32> to vector<16x128xf32>
    %75 = arith.mulf %71, %74 : vector<16x128xf32>
    %c1_54 = arith.constant 1 : index
    %c0_55 = arith.constant 0 : index
    %c0_56 = arith.constant 0 : index
    %76 = vector.load %arg6[%c1_54, %c0_55, %c0_56] : memref<2x1x128xf32, #tpu.memory_space<vmem>>, vector<1x1x128xf32>
    %77 = vector.shape_cast %76 : vector<1x1x128xf32> to vector<1x128xf32>
    %78 = vector.broadcast %77 : vector<1x128xf32> to vector<16x128xf32>
    %79 = arith.addf %75, %78 : vector<16x128xf32>
    %cst_57 = arith.constant 0.000000e+00 : f32
    %80 = vector.broadcast %cst_57 : f32 to vector<16x128xf32>
    %81 = arith.maximumf %79, %80 : vector<16x128xf32>
    %82 = arith.truncf %81 : vector<16x128xf32> to vector<16x128xbf16>
    %c1_58 = arith.constant 1 : index
    %c1_59 = arith.constant 1 : index
    %c0_60 = arith.constant 0 : index
    %c0_61 = arith.constant 0 : index
    %83 = vector.load %arg3[%c1_58, %c1_59, %c0_60, %c0_61] : memref<2x3x128x128xbf16, #tpu.memory_space<vmem>>, vector<1x1x128x128xbf16>
    %84 = vector.shape_cast %83 : vector<1x1x128x128xbf16> to vector<128x128xbf16>
    %cst_62 = arith.constant dense<0.000000e+00> : vector<16x128xf32>
    %85 = tpu.matmul %82, %84, %cst_62 {dimension_numbers = #tpu.dot_dimension_numbers<[1], [0], [0], [1], [0, 0, 1, 1], [], []>} : vector<16x128xbf16>, vector<128x128xbf16>, vector<16x128xf32> -> vector<16x128xf32>
    %c1_63 = arith.constant 1 : index
    %c0_64 = arith.constant 0 : index
    %c0_65 = arith.constant 0 : index
    %c0_66 = arith.constant 0 : index
    %86 = vector.load %arg3[%c1_63, %c0_64, %c0_65, %c0_66] : memref<2x3x128x128xbf16, #tpu.memory_space<vmem>>, vector<1x1x128x128xbf16>
    %87 = vector.shape_cast %86 : vector<1x1x128x128xbf16> to vector<128x128xbf16>
    %cst_67 = arith.constant dense<0.000000e+00> : vector<16x128xf32>
    %88 = tpu.matmul %82, %87, %cst_67 {dimension_numbers = #tpu.dot_dimension_numbers<[1], [0], [0], [1], [0, 0, 1, 1], [], []>} : vector<16x128xbf16>, vector<128x128xbf16>, vector<16x128xf32> -> vector<16x128xf32>
    %c8_i32 = arith.constant 8 : i32
    %89 = tpu.dynamic_rotate %88 by %c8_i32 dim 0 : vector<16x128xf32>, i32 -> vector<16x128xf32>
    %c8_i32_68 = arith.constant 8 : i32
    %90 = vector.broadcast %c8_i32_68 : i32 to vector<16x1xi32>
    %91 = arith.cmpi sge, %0, %90 : vector<16x1xi32>
    %cst_69 = arith.constant 0.000000e+00 : f32
    %92 = vector.shape_cast %91 : vector<16x1xi1> to vector<16x1xi1>
    %93 = vector.broadcast %92 : vector<16x1xi1> to vector<16x128xi1>
    %94 = vector.broadcast %cst_69 : f32 to vector<16x128xf32>
    %95 = arith.select %93, %89, %94 : vector<16x128xi1>, vector<16x128xf32>
    %96 = arith.addf %85, %95 : vector<16x128xf32>
    %c1_70 = arith.constant 1 : index
    %c2_71 = arith.constant 2 : index
    %c0_72 = arith.constant 0 : index
    %c0_73 = arith.constant 0 : index
    %97 = vector.load %arg3[%c1_70, %c2_71, %c0_72, %c0_73] : memref<2x3x128x128xbf16, #tpu.memory_space<vmem>>, vector<1x1x128x128xbf16>
    %98 = vector.shape_cast %97 : vector<1x1x128x128xbf16> to vector<128x128xbf16>
    %cst_74 = arith.constant dense<0.000000e+00> : vector<16x128xf32>
    %99 = tpu.matmul %82, %98, %cst_74 {dimension_numbers = #tpu.dot_dimension_numbers<[1], [0], [0], [1], [0, 0, 1, 1], [], []>} : vector<16x128xbf16>, vector<128x128xbf16>, vector<16x128xf32> -> vector<16x128xf32>
    %c8_i32_75 = arith.constant 8 : i32
    %100 = tpu.dynamic_rotate %99 by %c8_i32_75 dim 0 : vector<16x128xf32>, i32 -> vector<16x128xf32>
    %c8_i32_76 = arith.constant 8 : i32
    %101 = vector.broadcast %c8_i32_76 : i32 to vector<16x1xi32>
    %102 = arith.cmpi slt, %0, %101 : vector<16x1xi32>
    %cst_77 = arith.constant 0.000000e+00 : f32
    %103 = vector.shape_cast %102 : vector<16x1xi1> to vector<16x1xi1>
    %104 = vector.broadcast %103 : vector<16x1xi1> to vector<16x128xi1>
    %105 = vector.broadcast %cst_77 : f32 to vector<16x128xf32>
    %106 = arith.select %104, %100, %105 : vector<16x128xi1>, vector<16x128xf32>
    %107 = arith.addf %96, %106 : vector<16x128xf32>
    %c1_78 = arith.constant 1 : index
    %c0_79 = arith.constant 0 : index
    %c0_80 = arith.constant 0 : index
    %108 = vector.load %arg7[%c1_78, %c0_79, %c0_80] : memref<2x1x128xf32, #tpu.memory_space<vmem>>, vector<1x1x128xf32>
    %109 = vector.shape_cast %108 : vector<1x1x128xf32> to vector<1x128xf32>
    %110 = vector.broadcast %109 : vector<1x128xf32> to vector<16x128xf32>
    %111 = arith.mulf %107, %110 : vector<16x128xf32>
    %c1_81 = arith.constant 1 : index
    %c0_82 = arith.constant 0 : index
    %c0_83 = arith.constant 0 : index
    %112 = vector.load %arg8[%c1_81, %c0_82, %c0_83] : memref<2x1x128xf32, #tpu.memory_space<vmem>>, vector<1x1x128xf32>
    %113 = vector.shape_cast %112 : vector<1x1x128xf32> to vector<1x128xf32>
    %114 = vector.broadcast %113 : vector<1x128xf32> to vector<16x128xf32>
    %115 = arith.addf %111, %114 : vector<16x128xf32>
    %cst_84 = arith.constant 0.000000e+00 : f32
    %116 = vector.broadcast %cst_84 : f32 to vector<16x128xf32>
    %117 = arith.maximumf %115, %116 : vector<16x128xf32>
    %118 = arith.truncf %117 : vector<16x128xf32> to vector<16x128xbf16>
    %c1_85 = arith.constant 1 : index
    %c0_86 = arith.constant 0 : index
    %c0_87 = arith.constant 0 : index
    %119 = vector.load %arg4[%c1_85, %c0_86, %c0_87] : memref<2x128x512xbf16, #tpu.memory_space<vmem>>, vector<1x128x512xbf16>
    %120 = vector.shape_cast %119 : vector<1x128x512xbf16> to vector<128x512xbf16>
    %cst_88 = arith.constant dense<0.000000e+00> : vector<16x512xf32>
    %121 = tpu.matmul %118, %120, %cst_88 {dimension_numbers = #tpu.dot_dimension_numbers<[1], [0], [0], [1], [0, 0, 1, 1], [], []>} : vector<16x128xbf16>, vector<128x512xbf16>, vector<16x512xf32> -> vector<16x512xf32>
    %c1_89 = arith.constant 1 : index
    %c0_90 = arith.constant 0 : index
    %c0_91 = arith.constant 0 : index
    %122 = vector.load %arg9[%c1_89, %c0_90, %c0_91] : memref<2x1x512xf32, #tpu.memory_space<vmem>>, vector<1x1x512xf32>
    %123 = vector.shape_cast %122 : vector<1x1x512xf32> to vector<1x512xf32>
    %124 = vector.broadcast %123 : vector<1x512xf32> to vector<16x512xf32>
    %125 = arith.mulf %121, %124 : vector<16x512xf32>
    %c1_92 = arith.constant 1 : index
    %c0_93 = arith.constant 0 : index
    %c0_94 = arith.constant 0 : index
    %126 = vector.load %arg10[%c1_92, %c0_93, %c0_94] : memref<2x1x512xf32, #tpu.memory_space<vmem>>, vector<1x1x512xf32>
    %127 = vector.shape_cast %126 : vector<1x1x512xf32> to vector<1x512xf32>
    %128 = vector.broadcast %127 : vector<1x512xf32> to vector<16x512xf32>
    %129 = arith.addf %125, %128 : vector<16x512xf32>
    %cst_95 = arith.constant 0.000000e+00 : f32
    %130 = vector.broadcast %cst_95 : f32 to vector<16x512xf32>
    %131 = arith.maximumf %129, %130 : vector<16x512xf32>
    %132 = arith.addf %67, %131 : vector<16x512xf32>
    %c0_96 = arith.constant 0 : index
    %c0_97 = arith.constant 0 : index
    %c0_98 = arith.constant 0 : index
    %133 = vector.load %arg11[%c0_96, %c0_97, %c0_98] : memref<1x16x512xf32, #tpu.memory_space<vmem>>, vector<1x16x512xf32>
    %134 = vector.shape_cast %133 : vector<1x16x512xf32> to vector<16x512xf32>
    %135 = vector.shape_cast %132 : vector<16x512xf32> to vector<1x16x512xf32>
    tpu.vector_store %arg11[%c0_96, %c0_97, %c0_98], %135 {strides = array<i32>} : memref<1x16x512xf32, #tpu.memory_space<vmem>>, vector<1x16x512xf32>,
    return
  }
  func.func @transform_0(%arg0: i32) -> (i32, i32, i32) {
    %c0_i32 = arith.constant 0 : i32
    %c0_i32_0 = arith.constant 0 : i32
    %c0_i32_1 = arith.constant 0 : i32
    return %arg0, %c0_i32, %c0_i32_0 : i32, i32, i32
  }
  func.func @transform_1(%arg0: i32) -> (i32, i32, i32) {
    %c0_i32 = arith.constant 0 : i32
    %c0_i32_0 = arith.constant 0 : i32
    %c0_i32_1 = arith.constant 0 : i32
    %c0_i32_2 = arith.constant 0 : i32
    return %c0_i32, %c0_i32_0, %c0_i32_1 : i32, i32, i32
  }
  func.func @transform_2(%arg0: i32) -> (i32, i32, i32, i32) {
    %c0_i32 = arith.constant 0 : i32
    %c0_i32_0 = arith.constant 0 : i32
    %c0_i32_1 = arith.constant 0 : i32
    %c0_i32_2 = arith.constant 0 : i32
    %c0_i32_3 = arith.constant 0 : i32
    return %c0_i32, %c0_i32_0, %c0_i32_1, %c0_i32_2 : i32, i32, i32, i32
  }
  func.func @transform_3(%arg0: i32) -> (i32, i32, i32) {
    %c0_i32 = arith.constant 0 : i32
    %c0_i32_0 = arith.constant 0 : i32
    %c0_i32_1 = arith.constant 0 : i32
    %c0_i32_2 = arith.constant 0 : i32
    return %c0_i32, %c0_i32_0, %c0_i32_1 : i32, i32, i32
  }
  func.func @transform_4(%arg0: i32) -> (i32, i32, i32) {
    %c0_i32 = arith.constant 0 : i32
    %c0_i32_0 = arith.constant 0 : i32
    %c0_i32_1 = arith.constant 0 : i32
    %c0_i32_2 = arith.constant 0 : i32
    return %c0_i32, %c0_i32_0, %c0_i32_1 : i32, i32, i32
  }
  func.func @transform_5(%arg0: i32) -> (i32, i32, i32) {
    %c0_i32 = arith.constant 0 : i32
    %c0_i32_0 = arith.constant 0 : i32
    %c0_i32_1 = arith.constant 0 : i32
    %c0_i32_2 = arith.constant 0 : i32
    return %c0_i32, %c0_i32_0, %c0_i32_1 : i32, i32, i32
  }
  func.func @transform_6(%arg0: i32) -> (i32, i32, i32) {
    %c0_i32 = arith.constant 0 : i32
    %c0_i32_0 = arith.constant 0 : i32
    %c0_i32_1 = arith.constant 0 : i32
    %c0_i32_2 = arith.constant 0 : i32
    return %c0_i32, %c0_i32_0, %c0_i32_1 : i32, i32, i32
  }
  func.func @transform_7(%arg0: i32) -> (i32, i32, i32) {
    %c0_i32 = arith.constant 0 : i32
    %c0_i32_0 = arith.constant 0 : i32
    %c0_i32_1 = arith.constant 0 : i32
    %c0_i32_2 = arith.constant 0 : i32
    return %c0_i32, %c0_i32_0, %c0_i32_1 : i32, i32, i32
  }
  func.func @transform_8(%arg0: i32) -> (i32, i32, i32) {
    %c0_i32 = arith.constant 0 : i32
    %c0_i32_0 = arith.constant 0 : i32
    %c0_i32_1 = arith.constant 0 : i32
    %c0_i32_2 = arith.constant 0 : i32
    return %c0_i32, %c0_i32_0, %c0_i32_1 : i32, i32, i32
  }
  func.func @transform_9(%arg0: i32) -> (i32, i32, i32) {
    %c0_i32 = arith.constant 0 : i32
    %c0_i32_0 = arith.constant 0 : i32
    %c0_i32_1 = arith.constant 0 : i32
    %c0_i32_2 = arith.constant 0 : i32
    return %c0_i32, %c0_i32_0, %c0_i32_1 : i32, i32, i32
  }
  func.func @transform_10(%arg0: i32) -> (i32, i32, i32) {
    %c0_i32 = arith.constant 0 : i32
    %c0_i32_0 = arith.constant 0 : i32
    %c0_i32_1 = arith.constant 0 : i32
    return %arg0, %c0_i32, %c0_i32_0 : i32, i32, i32
  }
}

</mosaic_0001>

<bundles_post_ra>
// kernel: tpu_custom_call.1
= control target key start
LH: loop header
LB: loop body
LE: loop exit
PB: predicated region body
PF: predicated region fallthrough
CT: control target
= control target key end

     0   :  { %s4305_s0 = inlined_call_operand.hbm [shape: f32[2,16,512], index: 0, kind: input, shape index: {}]   ;;  %s4306_s1 = inlined_call_operand.hbm [shape: bf16[2,512,128], index: 1, kind: input, shape index: {}]   ;;  %s4307_s2 = inlined_call_operand.hbm [shape: bf16[2,3,128,128], index: 2, kind: input, shape index: {}]   ;;  %s4308_s3 = inlined_call_operand.hbm [shape: bf16[2,128,512], index: 3, kind: input, shape index: {}]   ;;  %s4309_s4 = inlined_call_operand.vmem [shape: f32[2,1,128], index: 4, kind: input, shape index: {}]   ;;  %s4310_s5 = inlined_call_operand.hbm [shape: f32[2,1,128], index: 5, kind: input, shape index: {}]   ;;  %s4311_s6 = inlined_call_operand.vmem [shape: f32[2,1,128], index: 6, kind: input, shape index: {}]   ;;  %s4312_s7 = inlined_call_operand.vmem [shape: f32[2,1,128], index: 7, kind: input, shape index: {}]   ;;  %s4313_s8 = inlined_call_operand.vmem [shape: f32[2,1,512], index: 8, kind: input, shape index: {}]   ;;  %s4314_s9 = inlined_call_operand.vmem [shape: f32[2,1,512], index: 9, kind: input, shape index: {}]   ;;  %s4315_s10 = inlined_call_operand.hbm [shape: f32[2,16,512], index: 10, kind: output, shape index: {}]  }
   0x1   :  { %4324 = sst [smem:[#allocation18_spill]] %s4306_s1 }
   0x2   :  { %4325 = sst [smem:[#allocation19_spill]] %s4315_s10 }
   0x3   :  { %15 = vsyncpa [#allocation3], 0 }
   0x4   :  { %17 = vsyncpa [#allocation3 + $0x1], 0 }
   0x5   :  { %18 = vsyncpa [#allocation6], 0 }
   0x6   :  { %19 = vsyncpa [#allocation9], 0 }
   0x7   :  { %20 = vsyncpa [#allocation4], 0 }
   0x8   :  { %22 = vsyncpa [#allocation4 + $0x1], 0  ;;  %s3826_s13 = smov 0   ;;  %s3828_s14 = smov 0  }
   0x9   :  { %s3830_s15 = smov 0   ;;  %s3832_s16 = smov 0  }
   0xa LB: > { %4326 = sst [smem:[#allocation16_spill]] %s3739_s13  ;;  %s3847_s17 = sadd.s32 4294967295, %s3751_s16   ;;  %s3751_s16 = sphi %s3832_s16, %s4353_s16   ;;  %s3747_s15 = sphi %s3830_s15, %s4352_s15   ;;  %s3743_s14 = sphi %s3828_s14, %s4351_s14   ;;  %s3739_s13 = sphi %s3826_s13, %s4350_s13  }
   0xb   : > { %s2745_s18 = sadd.s32 4294967294, %s3751_s16   ;;  %p48_p0 = scmp.ne.s32.totalorder %s3743_s14, %s3739_s13 }
   0xc   : > { %p4316_p1 = scmp.eq.s32.totalorder %s3847_s17, 0  ;;  %p267_p3 = scmp.eq.s32.totalorder %s2745_s18, 1 }
   0xd   : > { %p2746_p5 = scmp.ge.s32.totalorder %s3751_s16, 1  ;;  %p274_p7 = scmp.lt.s32.totalorder %s3751_s16, 3 }
   0xe   : > { %p3856_p4 = por %p4316_p1, %p48_p0  ;;  %p3861_p6 = por %p267_p3, %p48_p0 }
   0xf   : > { %p3866_p8 = pnand %p2746_p5, %p274_p7  ;;  %s3753_s22 = smov [#allocation5]  }
  0x10   : > { %s4327_s19 = scalar_select %p3856_p4, 1, 0 }
  0x11   : > { %s4328_s20 = scalar_select %p3861_p6, 1, 0 }
  0x12   : > { %s4330_s21 = scalar_select %p3866_p8, 1, 0 }
  0x13   : > { %4329 = sst [smem:[#allocation17_spill]] %s4328_s20  ;;  %s286_s23 = sshll.u32 %s3753_s22, 4  ;;  %s3870_s23 = int_to_ptr.vmem [resolvable:$true] %s286_s23 }
  0x14   : > { %p3240_p9 = pneg %p3866_p8  ;;  %s3754_s25 = smov [#allocation8]  }
  0x15   : > { %s312_s26 = sshll.u32 %s3754_s25, 4  ;;  %s4332_s1 = sld [smem:[#allocation18_spill]]  ;;  %s3881_s26 = int_to_ptr.vmem [resolvable:$true] %s312_s26 }
  0x16   : > { %p3877_p11 = pnand %p3240_p9, %p4316_p1 }
  0x18   : > { %p3891_p13 = pneg %p3877_p11 }
  0x1b   : > { %s3535_s29 = scalar_lea.hbm %s4332_s1, 8192 }
  0x1c   : > { %p3536_p12 = scmp.ne.s32.totalorder %s4332_s1, %s3535_s29  ;;  %p3542_p5 = scmp.lt.u32.totalorder %s3535_s29, %s4332_s1 }
  0x1e   : > { %p3538_p0 = pnand %p3891_p13, %p3536_p12 }
  0x20   : > { %p3539_p3 = pneg %p3538_p0 }
  0x22   : > { %p3544_p7 = pnand %p3542_p5, %p3539_p3 }
  0x24   : > { %3547 = shalt.err (!%p3544_p7)
}
  0x25   : > { %s3548_s25 = scalar_lea.vmem %s3870_s23, 8192  ;;  %p3556_p2 = scmp.lt.s32.totalorder %s3870_s23, %s3870_s23 }
  0x26   : > { %p3549_p9 = scmp.ne.s32.totalorder %s3870_s23, %s3548_s25  ;;  %p3557_p6 = scmp.lt.s32.totalorder %s3548_s25, %s3548_s25 }
  0x28   : > { %p3551_p10 = pnand %p3549_p9, %p3891_p13  ;;  %p3558_p12 = por %p3557_p6, %p3556_p2 }
  0x2a   : > { %p3552_p1 = pneg %p3551_p10 }
  0x2c   : > { %p3559_p0 = pnand %p3558_p12, %p3552_p1 }
  0x2e   : > { %3562 = shalt.err (!%p3559_p0)
}
  0x2f   : > { %s4320_s27 = smov 64   ;;  %s4321_s28 = smov 4  }
  0x30   : > { %3243 = dma.hbm_to_vmem [thread:$0]  (!%p3877_p11), %s4332_s1, 8192, %s3870_s23, [#allocation6], %s4320_s27, %s4320_s27, %s4321_s28  }
  0x31   : > { %s3563_s22 = scalar_lea.hbm %s4308_s3, 8192 }
  0x32   : > { %p3564_p1 = scmp.ne.s32.totalorder %s4308_s3, %s3563_s22  ;;  %p3570_p10 = scmp.lt.u32.totalorder %s3563_s22, %s4308_s3 }
  0x34   : > { %p3566_p2 = pnand %p3564_p1, %p3891_p13 }
  0x36   : > { %p3567_p6 = pneg %p3566_p2 }
  0x38   : > { %p3572_p3 = pnand %p3570_p10, %p3567_p6 }
  0x3a   : > { %3575 = shalt.err (!%p3572_p3)
}
  0x3b   : > { %s3576_s23 = scalar_lea.vmem %s3881_s26, 8192  ;;  %p3584_p12 = scmp.lt.s32.totalorder %s3881_s26, %s3881_s26 }
  0x3c   : > { %p3577_p5 = scmp.ne.s32.totalorder %s3881_s26, %s3576_s23  ;;  %p3585_p0 = scmp.lt.s32.totalorder %s3576_s23, %s3576_s23 }
  0x3e   : > { %p3579_p7 = pnand %p3577_p5, %p3891_p13  ;;  %p3586_p1 = por %p3585_p0, %p3584_p12 }
  0x40   : > { %p3580_p9 = pneg %p3579_p7 }
  0x42   : > { %p3587_p2 = pnand %p3586_p1, %p3580_p9 }
  0x44   : > { %3590 = shalt.err (!%p3587_p2)
}
  0x45   : > { %s3757_s20 = smov 256   ;;  %s3758_s10 = smov 16  }
  0x46   : > { %3249 = dma.hbm_to_vmem [thread:$0]  (!%p3877_p11), %s4308_s3, 8192, %s3881_s26, [#allocation9], %s3757_s20, %s3757_s20, %s3758_s10  }
  0x47   : > { %s3759_s30 = smov [#allocation7]   ;;  %s3760_s18 = smov [#allocation10]  }
  0x48   : > { %s299_s11 = sshll.u32 %s3759_s30, 4  ;;  %s328_s22 = sshll.u32 %s3760_s18, 4  ;;  %s300_s11 = int_to_ptr.vmem [resolvable:$true] %s299_s11  ;;  %s3939_s22 = int_to_ptr.vmem [resolvable:$true] %s328_s22 }
  0x49   : > { %s3591_s27 = scalar_lea.hbm %s4307_s2, 6144 }
  0x4a   : > { %p3592_p6 = scmp.ne.s32.totalorder %s4307_s2, %s3591_s27  ;;  %p3598_p5 = scmp.lt.u32.totalorder %s3591_s27, %s4307_s2 }
  0x4c   : > { %p3594_p10 = pnand %p3592_p6, %p3891_p13 }
  0x4e   : > { %p3595_p3 = pneg %p3594_p10 }
  0x50   : > { %p3600_p7 = pnand %p3598_p5, %p3595_p3 }
  0x52   : > { %3603 = shalt.err (!%p3600_p7)
}
  0x53   : > { %s3604_s20 = scalar_lea.vmem %s300_s11, 6144  ;;  %p3612_p1 = scmp.lt.s32.totalorder %s300_s11, %s300_s11 }
  0x54   : > { %p3605_p9 = scmp.ne.s32.totalorder %s300_s11, %s3604_s20  ;;  %p3613_p2 = scmp.lt.s32.totalorder %s3604_s20, %s3604_s20 }
  0x56   : > { %p3607_p12 = pnand %p3605_p9, %p3891_p13  ;;  %p3614_p4 = por %p3613_p2, %p3612_p1 }
  0x58   : > { %p3608_p0 = pneg %p3607_p12 }
  0x5a   : > { %p3615_p8 = pnand %p3614_p4, %p3608_p0 }
  0x5c   : > { %3618 = shalt.err (!%p3615_p8)
}
  0x5d   : > { %s4334_s1 = smov 4   ;;  %s4335_s28 = smov 64  }
  0x5e   : > { %3246 = dma.hbm_to_vmem [thread:$0]  (!%p3877_p11), %s4307_s2, 6144, %s300_s11, [#allocation6], %s4335_s28, %s4335_s28, %s4334_s1  }
  0x5f   : > { %s3619_s25 = scalar_lea.hbm %s4310_s5, 32 }
  0x60   : > { %p3620_p6 = scmp.ne.s32.totalorder %s4310_s5, %s3619_s25  ;;  %p3626_p10 = scmp.lt.u32.totalorder %s3619_s25, %s4310_s5 }
  0x62   : > { %p3622_p4 = pnand %p3620_p6, %p3891_p13 }
  0x64   : > { %p3623_p8 = pneg %p3622_p4 }
  0x66   : > { %p3628_p3 = pnand %p3626_p10, %p3623_p8 }
  0x68   : > { %3631 = shalt.err (!%p3628_p3)
}
  0x69   : > { %s3632_s11 = scalar_lea.vmem %s3939_s22, 32  ;;  %p3640_p12 = scmp.lt.s32.totalorder %s3939_s22, %s3939_s22 }
  0x6a   : > { %p3633_p5 = scmp.ne.s32.totalorder %s3939_s22, %s3632_s11  ;;  %p3641_p0 = scmp.lt.s32.totalorder %s3632_s11, %s3632_s11 }
  0x6c   : > { %p3635_p7 = pnand %p3633_p5, %p3891_p13  ;;  %p3642_p1 = por %p3641_p0, %p3640_p12 }
  0x6e   : > { %p3636_p9 = pneg %p3635_p7 }
  0x70   : > { %p3643_p2 = pnand %p3642_p1, %p3636_p9 }
  0x72   : > { %3646 = shalt.err (!%p3643_p2)
}
  0x73   : > { %s3761_s1 = smov 1   ;;  %s3988_s12 = sadd.s32 1, %s3751_s16  }
  0x74   : > { %3252 = dma.hbm_to_vmem [thread:$0]  (!%p3877_p11), %s4310_s5, 32, %s3939_s22, [#allocation9], %s3758_s10, %s3758_s10, %s3761_s1  }
  0x75   : > { %s32_s24 = ssub.s32 %s3751_s16, %s3988_s12  ;;  %s35_s27 = sadd.s32 1, %s3747_s15 }
  0x76   : > { %p33_p13 = scmp.eq.s32.totalorder %s32_s24, 0  ;;  %p42_p6 = scmp.ne.s32.totalorder %s3747_s15, %s3743_s14 }
  0x77   : > { %p43_p4 = scmp.eq.s32.totalorder %s3751_s16, 0  ;;  %p3265_p8 = scmp.lt.s32.totalorder %s3751_s16, 2 }
  0x78   : > { %s3998_s30 = scalar_select %p33_p13, %s3747_s15, %s35_s27  }
  0x79   : > { %p44_p10 = por %p43_p4, %p42_p6  ;;  %p4336_p3 = scmp.eq.s32.totalorder %s3847_s17, 1 }
  0x7a   : > { %s354_s25 = sand.u32 1, %s3747_s15   ;;  %s2956_s23 = sshll.u32 %s3751_s16, 10 }
  0x7b   : > { %p4002_p5 = por %p4336_p3, %p42_p6  ;;  %s2752_s10 = sshll.u32 %s354_s25, 6 }
  0x7c   : > { %s4011_s26 = scalar_lea.hbm %s4305_s0, %s2956_s23  ;;  %s358_s20 = scalar_lea.vmem [#allocation2], %s2752_s10 }
  0x7d   : > { %s365_s11 = sshll.u32 %s358_s20, 4  ;;  %p4013_p11 = pnand %p3265_p8, %p44_p10  ;;  %s4017_s11 = int_to_ptr.vmem [resolvable:$true] %s365_s11 }
  0x7e   : > { %s4019_s28 = scalar_lea.sflag [#allocation3], %s354_s25  ;;  %s3647_s29 = scalar_lea.hbm %s4011_s26, 1024 }
  0x7f   : > { %p3648_p7 = scmp.ne.s32.totalorder %s4011_s26, %s3647_s29  ;;  %p3649_p9 = pneg %p4013_p11 }
  0x80   : > { %s3652_s23 = scalar_lea.hbm %s4305_s0, 2048  ;;  %p3653_p1 = scmp.lt.u32.totalorder %s4011_s26, %s4305_s0 }
  0x81   : > { %p3650_p12 = pnand %p3649_p9, %p3648_p7  ;;  %p3654_p2 = scmp.lt.u32.totalorder %s3652_s23, %s3647_s29 }
  0x82   : > { %p3656_p6 = scmp.lt.u32.totalorder %s3647_s29, %s4011_s26 }
  0x83   : > { %p3651_p0 = pneg %p3650_p12  ;;  %p3655_p13 = por %p3654_p2, %p3653_p1 }
  0x85   : > { %p3657_p4 = por %p3656_p6, %p3655_p13 }
  0x87   : > { %p3658_p8 = pnand %p3657_p4, %p3651_p0 }
  0x89   : > { %3661 = shalt.err (!%p3658_p8)
}
  0x8a   : > { %s3662_s25 = scalar_lea.vmem %s4017_s11, 1024  ;;  %s3762_s13 = smov [#allocation2]  }
  0x8b   : > { %p3663_p10 = scmp.ne.s32.totalorder %s4017_s11, %s3662_s25  ;;  %s3667_s20 = sshll.u32 %s3762_s13, 4  ;;  %s3668_s20 = int_to_ptr.vmem [resolvable:$false] %s3667_s20 }
  0x8c   : > { %s3669_s24 = scalar_lea.vmem %s3668_s20, 2048  ;;  %p3670_p12 = scmp.lt.s32.totalorder %s4017_s11, %s3668_s20 }
  0x8d   : > { %p3665_p3 = pnand %p3663_p10, %p3649_p9  ;;  %p3671_p1 = scmp.lt.s32.totalorder %s3669_s24, %s3662_s25 }
  0x8f   : > { %p3666_p7 = pneg %p3665_p3  ;;  %p3672_p2 = por %p3671_p1, %p3670_p12 }
  0x91   : > { %p3673_p13 = pnand %p3672_p2, %p3666_p7 }
  0x93   : > { %3676 = shalt.err (!%p3673_p13)
}
  0x94   : > { %s3763_s29 = smov 512   ;;  %s3764_s27 = smov 32  }
  0x95   : > { %3256 = dma.hbm_to_vmem [thread:$0]  (!%p4013_p11), %s4011_s26, 1024, %s4017_s11, %s4019_s28, %s3763_s29, %s3763_s29, %s3764_s27  }
  0x96   : > { %p4339_p9 = scmp.ne.s32.totalorder %s4330_s21, 0 }
  0x97   : > { %s4050_s23 = sand.u32 (!%p4339_p9), 1, %s3743_s14   ;;  %p4340_p0 = scmp.ne.s32.totalorder (!%p4339_p9), %s4327_s19, 0 }
  0x98   : > { %377 = sbr.rel (%p4339_p9) target bundleno = 1636 (0x664), region = 60  ;;  %s2756_s10 = sshll.u32 (!%p4339_p9), %s4050_s23, 6 }
  0x99   : > { %s380_s22 = scalar_lea.sflag (!%p4339_p9), [#allocation3], %s4050_s23  ;;  %s4056_s25 = scalar_lea.vmem (!%p4339_p9), [#allocation2], %s2756_s10 }
  0x9f   : > { %3722 = dma.done.wait (%p4340_p0), %s380_s22, 1024  }
  0xa0   : > { %3724 = vsyncadd (%p4340_p0), %s380_s22, 4294966272  ;;  %p4341_p11 = scmp.eq.s32.totalorder %s3847_s17, 0 }
  0xa2   : > { %3726 = dma.done.wait (%p4341_p11), [#allocation6], 14336   ;;  %p4342_p6 = pmov %p4341_p11 }
  0xa4   : > { %3728 = vsyncadd (%p4342_p6), [#allocation6], 4294952960  ;;  %p4343_p4 = pmov %p4342_p6 }
  0xa6   : > { %3730 = dma.done.wait (%p4343_p4), [#allocation9], 8224   ;;  %p4344_p8 = pmov %p4343_p4 }
  0xa7   : > { %v3319_v0 = vld [vmem:[#allocation5 + $0x40] sm:$0xff]   ;;  %v3323_v4 = vld [vmem:[#allocation5 + $0x48] sm:$0xff]   ;;  %v3327_v8 = vld [vmem:[#allocation5 + $0x50] sm:$0xff]   ;;  %v3765_v39 = vmov 0.0   ;;  %vm3766_vm0 = vmmov 0   ;;  %s2957_s20 = sshll.u32 %s3847_s17, 10 }
  0xa8   : > { %3732 = vsyncadd (%p4344_p8), [#allocation9], 4294959072  ;;  %v3320_v1 = vld [vmem:[#allocation5 + $0xc0] sm:$0xff]   ;;  %2958 = vmatprep.subr.bf16.mxu0 %v3319_v0  ;;  %v3324_v5 = vld [vmem:[#allocation5 + $0xc8] sm:$0xff]   ;;  %s435_s24 = scalar_lea.vmem [#allocation11], %s2756_s10  ;;  %s4345_s27 = sld [smem:[#allocation19_spill]] }
  0xa9   : > { %v3321_v2 = vld [vmem:[#allocation5] sm:$0xff]   ;;  %2980 = vmatprep.subr.bf16.mxu1 %v3320_v1  ;;  %v3325_v6 = vld [vmem:[#allocation5 + $0x8] sm:$0xff]   ;;  %v3328_v9 = vld [vmem:[#allocation5 + $0xd0] sm:$0xff]   ;;  %s2634_s29 = sshll.u32 %s435_s24, 4  ;;  %s3768_s21 = smov [#allocation11]   ;;  %s4259_s29 = int_to_ptr.vmem [resolvable:$true] %s2634_s29 }
  0xaa   : > { %v3322_v3 = vld [vmem:[#allocation5 + $0x80] sm:$0xff]   ;;  %2959 = vmatpush3.bf16.msra.mxu0 %v3321_v2  ;;  %v3326_v7 = vld [vmem:[#allocation5 + $0x88] sm:$0xff]   ;;  %v3329_v10 = vld [vmem:[#allocation5 + $0x10] sm:$0xff]   ;;  %s3677_s19 = scalar_lea.vmem %s4259_s29, 1024  ;;  %s3681_s26 = sshll.u32 %s3768_s21, 4  ;;  %s3682_s26 = int_to_ptr.vmem [resolvable:$false] %s3681_s26 }
  0xab   : > { %2981 = vmatpush3.bf16.msra.mxu1 %v3322_v3  ;;  %2960 = vmatprep.subr.bf16.mxu0 %v3323_v4  ;;  %v3330_v11 = vld [vmem:[#allocation5 + $0x90] sm:$0xff]   ;;  %v3331_v12 = vld [vmem:[#allocation5 + $0x58] sm:$0xff]   ;;  %v3335_v16 = vld [vmem:[#allocation5 + $0x60] sm:$0xff]   ;;  %p3678_p10 = scmp.ne.s32.totalorder %s4259_s29, %s3677_s19  ;;  %s3683_s11 = scalar_lea.vmem %s3682_s26, 2048 }
  0xac   : > { %2982 = vmatprep.subr.bf16.mxu1 %v3324_v5  ;;  %v3332_v13 = vld [vmem:[#allocation5 + $0xd8] sm:$0xff]   ;;  %v3336_v17 = vld [vmem:[#allocation5 + $0xe0] sm:$0xff]   ;;  %v3339_v20 = vld [vmem:[#allocation5 + $0x68] sm:$0xff]   ;;  %p3684_p12 = scmp.lt.s32.totalorder %s4259_s29, %s3682_s26  ;;  %p3685_p1 = scmp.lt.s32.totalorder %s3683_s11, %s3677_s19 }
  0xad   : > { %v3333_v14 = vld [vmem:[#allocation5 + $0x18] sm:$0xff]   ;;  %v3337_v18 = vld [vmem:[#allocation5 + $0x20] sm:$0xff]   ;;  %v3340_v21 = vld [vmem:[#allocation5 + $0xe8] sm:$0xff]   ;;  %p3679_p3 = pnand %p3678_p10, %p4002_p5 }
  0xae   : > { %2961 = vmatpush3.bf16.msra.mxu0 %v3325_v6  ;;  %v3334_v15 = vld [vmem:[#allocation5 + $0x98] sm:$0xff]   ;;  %v3338_v19 = vld [vmem:[#allocation5 + $0xa0] sm:$0xff]   ;;  %v3341_v22 = vld [vmem:[#allocation5 + $0x28] sm:$0xff]   ;;  %s4257_s22 = scalar_lea.hbm %s4345_s27, %s2957_s20  ;;  %p3686_p2 = por %p3685_p1, %p3684_p12 }
  0xaf   : > { %2983 = vmatpush3.bf16.msra.mxu1 %v3326_v7  ;;  %2962 = vmatprep.subr.bf16.mxu0 %v3327_v8  ;;  %v3342_v23 = vld [vmem:[#allocation5 + $0xa8] sm:$0xff]   ;;  %v3343_v24 = vld [vmem:[#allocation5 + $0x70] sm:$0xff]   ;;  %v3347_v28 = vld [vmem:[#allocation5 + $0x78] sm:$0xff]   ;;  %p3680_p7 = pneg %p3679_p3 }
  0xb0   : > { %2984 = vmatprep.subr.bf16.mxu1 %v3328_v9  ;;  %v3344_v25 = vld [vmem:[#allocation5 + $0xf0] sm:$0xff]   ;;  %v3348_v29 = vld [vmem:[#allocation5 + $0xf8] sm:$0xff]   ;;  %v441_v32 = vld [vmem:[%s4056_s25 + $0x8] sm:$0xff] }
  0xb1   : > { %v3345_v26 = vld [vmem:[#allocation5 + $0x30] sm:$0xff]   ;;  %v3349_v30 = vld [vmem:[#allocation5 + $0x38] sm:$0xff]   ;;  %v445_v33 = vld [vmem:[%s4056_s25 + $0x28] sm:$0xff]  ;;  %p3687_p13 = pnand %p3686_p2, %p3680_p7 }
  0xb2   : > { %2963 = vmatpush3.bf16.msra.mxu0 %v3329_v10  ;;  %v3346_v27 = vld [vmem:[#allocation5 + $0xb0] sm:$0xff]   ;;  %v3350_v31 = vld [vmem:[#allocation5 + $0xb8] sm:$0xff]   ;;  %v449_v35 = vpack.c.bf16 %v445_v33, %v441_v32  ;;  %v440_v37 = vld [vmem:[%s4056_s25] sm:$0xff] }
  0xb3   : > { %2985 = vmatpush3.bf16.msra.mxu1 %v3330_v11  ;;  %2964 = vmatprep.subr.bf16.mxu0 %v3331_v12  ;;  %v443_v34 = vld [vmem:[%s4056_s25 + $0x18] sm:$0xff]  ;;  %v444_v38 = vld [vmem:[%s4056_s25 + $0x20] sm:$0xff]  ;;  %v442_v42 = vld [vmem:[%s4056_s25 + $0x10] sm:$0xff] }
  0xb4   : > { %2986 = vmatprep.subr.bf16.mxu1 %v3332_v13  ;;  %v447_v36 = vld [vmem:[%s4056_s25 + $0x38] sm:$0xff]  ;;  %v448_v41 = vpack.c.bf16 %v444_v38, %v440_v37  ;;  %v446_v43 = vld [vmem:[%s4056_s25 + $0x30] sm:$0xff]  ;;  %740 = vmatprep.mubr.bf16.mxu0 %v449_v35  ;;  %v3351_v45 = vld [vmem:[#allocation7] sm:$0xff]  }
  0xb5   : > { %v451_v40 = vpack.c.bf16 %v447_v36, %v443_v34  ;;  %v450_v44 = vpack.c.bf16 %v446_v43, %v442_v42  ;;  %v3352_v46 = vld [vmem:[#allocation7 + $0x40] sm:$0xff]   ;;  %v3353_v47 = vld [vmem:[#allocation7 + $0x8] sm:$0xff]   ;;  %v3355_v49 = vld [vmem:[#allocation7 + $0x10] sm:$0xff]  }
  0xb6   : > { %2965 = vmatpush3.bf16.msra.mxu0 %v3333_v14  ;;  %v3354_v48 = vld [vmem:[#allocation7 + $0x48] sm:$0xff]   ;;  %v3356_v50 = vld [vmem:[#allocation7 + $0x50] sm:$0xff]   ;;  %v3357_v51 = vld [vmem:[#allocation7 + $0x18] sm:$0xff]  }
  0xb7   : > { %2987 = vmatpush3.bf16.msra.mxu1 %v3334_v15  ;;  %2966 = vmatprep.subr.bf16.mxu0 %v3335_v16  ;;  %v3358_v52 = vld [vmem:[#allocation7 + $0x58] sm:$0xff]   ;;  %v3359_v53 = vld [vmem:[#allocation7 + $0x20] sm:$0xff]   ;;  %v3361_v55 = vld [vmem:[#allocation7 + $0x28] sm:$0xff]  }
  0xb8   : > { %2988 = vmatprep.subr.bf16.mxu1 %v3336_v17  ;;  %781 = vmatprep.mubr.bf16.mxu1 %v451_v40  ;;  %v3360_v54 = vld [vmem:[#allocation7 + $0x60] sm:$0xff]   ;;  %v3362_v56 = vld [vmem:[#allocation7 + $0x68] sm:$0xff]   ;;  %v3363_v57 = vld [vmem:[#allocation7 + $0x30] sm:$0xff]  }
  0xb9   : > { %v3364_v58 = vld [vmem:[#allocation7 + $0x70] sm:$0xff]   ;;  %v3365_v59 = vld [vmem:[#allocation7 + $0x38] sm:$0xff]   ;;  %v2794_v6 = vld [vmem:[%s4309_s4] ss:$0 sm:$0xff] }
  0xba   : > { %2967 = vmatpush3.bf16.msra.mxu0 %v3337_v18  ;;  %v3366_v60 = vld [vmem:[#allocation7 + $0x78] sm:$0xff]   ;;  %v2795_v11 = vld [vmem:[#allocation10] ss:$0 sm:$0xff]  ;;  %v3383_v32 = vld [vmem:[#allocation8 + $0x24] ss:$16 sps:$4 sm:$0xff]  }
  0xbb   : > { %2989 = vmatpush3.bf16.msra.mxu1 %v3338_v19  ;;  %2968 = vmatprep.subr.bf16.mxu0 %v3339_v20  ;;  %v3367_v19 = vld [vmem:[#allocation7 + $0x80] sm:$0xff]   ;;  %v3386_v33 = vld [vmem:[#allocation8 + $0x2c] ss:$16 sps:$4 sm:$0xff]   ;;  %v3384_v35 = vld [vmem:[#allocation8 + $0x28] ss:$16 sps:$4 sm:$0xff]  }
  0xbc   : > { %2990 = vmatprep.subr.bf16.mxu1 %v3340_v21  ;;  %v3368_v21 = vld [vmem:[#allocation7 + $0x88] sm:$0xff]   ;;  %v3381_v34 = vld [vmem:[#allocation8 + $0x20] ss:$16 sps:$4 sm:$0xff]   ;;  %v3389_v36 = vld [vmem:[#allocation8 + $0x44] ss:$16 sps:$4 sm:$0xff]  }
  0xbd   : > { %v3392_v37 = vld [vmem:[#allocation8 + $0x4c] ss:$16 sps:$4 sm:$0xff]   ;;  %v3387_v38 = vld [vmem:[#allocation8 + $0x40] ss:$16 sps:$4 sm:$0xff]   ;;  %v3390_v40 = vld [vmem:[#allocation8 + $0x48] ss:$16 sps:$4 sm:$0xff]  }
  0xbe   : > { %2969 = vmatpush3.bf16.msra.mxu0 %v3341_v22  ;;  %v3369_v22 = vld [vmem:[#allocation7 + $0x90] sm:$0xff]   ;;  %v3398_v42 = vld [vmem:[#allocation8 + $0x6c] ss:$16 sps:$4 sm:$0xff]  }
  0xbf   : > { %2991 = vmatpush3.bf16.msra.mxu1 %v3342_v23  ;;  %2970 = vmatprep.subr.bf16.mxu0 %v3343_v24  ;;  %v3370_v23 = vld [vmem:[#allocation7 + $0x98] sm:$0xff]   ;;  %v3371_v24 = vld [vmem:[#allocation7 + $0xa0] sm:$0xff]  }
  0xc0   : > { %2992 = vmatprep.subr.bf16.mxu1 %v3344_v25  ;;  %v3372_v25 = vld [vmem:[#allocation7 + $0xa8] sm:$0xff]   ;;  %v3393_v43 = vld [vmem:[#allocation8 + $0x60] ss:$16 sps:$4 sm:$0xff]  }
  0xc2   : > { %2971 = vmatpush3.bf16.msra.mxu0 %v3345_v26  ;;  %v3373_v26 = vld [vmem:[#allocation7 + $0xb0] sm:$0xff]  }
  0xc3   : > { %2993 = vmatpush3.bf16.msra.mxu1 %v3346_v27  ;;  %2972 = vmatprep.subr.bf16.mxu0 %v3347_v28  ;;  %v3374_v27 = vld [vmem:[#allocation7 + $0xb8] sm:$0xff]   ;;  %v3375_v28 = vld [vmem:[#allocation8] ss:$16 sps:$4 sm:$0xff]  }
  0xc4   : > { %2994 = vmatprep.subr.bf16.mxu1 %v3348_v29  ;;  %v3377_v29 = vld [vmem:[#allocation8 + $0x4] ss:$16 sps:$4 sm:$0xff]  }
  0xc6   : > { %2973 = vmatpush3.bf16.msra.mxu0 %v3349_v30  ;;  %v3378_v30 = vld [vmem:[#allocation8 + $0x8] ss:$16 sps:$4 sm:$0xff]  }
  0xc7   : > { %2995 = vmatpush3.bf16.msra.mxu1 %v3350_v31  ;;  %3100 = vmatprep.subr.bf16.mxu0 %v3765_v39  ;;  %v3380_v31 = vld [vmem:[#allocation8 + $0xc] ss:$16 sps:$4 sm:$0xff]  }
  0xc8   : > { %3120 = vmatprep.subr.bf16.mxu1 %v3765_v39 }
  0xc9   : > { %741 = vmatmul.mubr.bf16.vlgmr.msra.gmra.mrb[0].mxu0 %v448_v41  ;;  %v3395_v41 = vld [vmem:[#allocation8 + $0x64] ss:$16 sps:$4 sm:$0xff]  }
  0xca   : > { %782 = vmatmul.mubr.bf16.vlgmr.msra.gmra.mrb[0].mxu1 %v450_v44  ;;  %3101 = vmatpush3.bf16.msra.mxu0 %v3351_v45  ;;  %v3396_v44 = vld [vmem:[#allocation8 + $0x68] ss:$16 sps:$4 sm:$0xff]   ;;  %v3401_v45 = vld [vmem:[#allocation8 + $0x84] ss:$16 sps:$4 sm:$0xff]  }
  0xcb   : > { %3121 = vmatpush3.bf16.msra.mxu1 %v3352_v46  ;;  %3102 = vmatprep.subr.bf16.mxu0 %v3765_v39  ;;  %v3404_v46 = vld [vmem:[#allocation8 + $0x8c] ss:$16 sps:$4 sm:$0xff]  }
  0xcc   : > { %3122 = vmatprep.subr.bf16.mxu1 %v3765_v39  ;;  %3116 = vmatprep.mubr.msk.bf16.mxu0 %vm3766_vm0, %v3765_v39 }
  0xcd   : > { %3136 = vmatprep.mubr.msk.bf16.mxu1 %vm3766_vm0, %v3765_v39 }
  0xce   : > { %3103 = vmatpush3.bf16.msra.mxu0 %v3353_v47  ;;  %v3399_v47 = vld [vmem:[#allocation8 + $0x80] ss:$16 sps:$4 sm:$0xff]  }
  0xcf   : > { %3123 = vmatpush3.bf16.msra.mxu1 %v3354_v48  ;;  %3104 = vmatprep.subr.bf16.mxu0 %v3765_v39  ;;  %v3402_v48 = vld [vmem:[#allocation8 + $0x88] ss:$16 sps:$4 sm:$0xff]  }
  0xd0   : > { %3124 = vmatprep.subr.bf16.mxu1 %v3765_v39 }
  0xd2   : > { %3105 = vmatpush3.bf16.msra.mxu0 %v3355_v49  ;;  %v3407_v49 = vld [vmem:[#allocation8 + $0xa4] ss:$16 sps:$4 sm:$0xff]  }
  0xd3   : > { %3125 = vmatpush3.bf16.msra.mxu1 %v3356_v50  ;;  %3106 = vmatprep.subr.bf16.mxu0 %v3765_v39  ;;  %v3410_v50 = vld [vmem:[#allocation8 + $0xac] ss:$16 sps:$4 sm:$0xff]  }
  0xd4   : > { %3126 = vmatprep.subr.bf16.mxu1 %v3765_v39 }
  0xd6   : > { %3107 = vmatpush3.bf16.msra.mxu0 %v3357_v51  ;;  %v3405_v51 = vld [vmem:[#allocation8 + $0xa0] ss:$16 sps:$4 sm:$0xff]  }
  0xd7   : > { %3127 = vmatpush3.bf16.msra.mxu1 %v3358_v52  ;;  %3108 = vmatprep.subr.bf16.mxu0 %v3765_v39  ;;  %v3408_v52 = vld [vmem:[#allocation8 + $0xa8] ss:$16 sps:$4 sm:$0xff]  }
  0xd8   : > { %3128 = vmatprep.subr.bf16.mxu1 %v3765_v39 }
  0xda   : > { %3109 = vmatpush3.bf16.msra.mxu0 %v3359_v53  ;;  %v3413_v53 = vld [vmem:[#allocation8 + $0xc4] ss:$16 sps:$4 sm:$0xff]  }
  0xdb   : > { %3129 = vmatpush3.bf16.msra.mxu1 %v3360_v54  ;;  %3110 = vmatprep.subr.bf16.mxu0 %v3765_v39  ;;  %v3416_v54 = vld [vmem:[#allocation8 + $0xcc] ss:$16 sps:$4 sm:$0xff]  }
  0xdc   : > { %3130 = vmatprep.subr.bf16.mxu1 %v3765_v39 }
  0xde   : > { %3111 = vmatpush3.bf16.msra.mxu0 %v3361_v55  ;;  %v3411_v55 = vld [vmem:[#allocation8 + $0xc0] ss:$16 sps:$4 sm:$0xff]  }
  0xdf   : > { %3131 = vmatpush3.bf16.msra.mxu1 %v3362_v56  ;;  %3112 = vmatprep.subr.bf16.mxu0 %v3765_v39  ;;  %v3414_v56 = vld [vmem:[#allocation8 + $0xc8] ss:$16 sps:$4 sm:$0xff]  }
  0xe0   : > { %3132 = vmatprep.subr.bf16.mxu1 %v3765_v39 }
  0xe2   : > { %3113 = vmatpush3.bf16.msra.mxu0 %v3363_v57  ;;  %v3417_v57 = vld [vmem:[#allocation8 + $0xe0] ss:$16 sps:$4 sm:$0xff]  }
  0xe3   : > { %3133 = vmatpush3.bf16.msra.mxu1 %v3364_v58  ;;  %3114 = vmatprep.subr.bf16.mxu0 %v3765_v39  ;;  %v3419_v58 = vld [vmem:[#allocation8 + $0xe4] ss:$16 sps:$4 sm:$0xff]  }
  0xe4   : > { %3134 = vmatprep.subr.bf16.mxu1 %v3765_v39 }
  0xe6   : > { %3115 = vmatpush3.bf16.msra.mxu0 %v3365_v59  ;;  %v3420_v59 = vld [vmem:[#allocation8 + $0xe8] ss:$16 sps:$4 sm:$0xff]  }
  0xe7   : > { %3135 = vmatpush3.bf16.msra.mxu1 %v3366_v60  ;;  %3140 = vmatprep.subr.bf16.mxu0 %v3765_v39  ;;  %v3422_v60 = vld [vmem:[#allocation8 + $0xec] ss:$16 sps:$4 sm:$0xff]  }
  0xe8   : > { %1368 = vmatprep.subr.bf16.mxu1 %v3377_v29 }
 0x19c   : > { %v2974_v61 = vpop.f32.mrb[0].mxu0 }
 0x19d   : > { %v2996_v62 = vpop.f32.mrb[0].mxu1  ;;  %v2975_v63 = vpop.f32.mrb[1].mxu0 }
 0x19e   : > { %v2976_v0 = vadd.f32 %v2975_v63, %v2974_v61  ;;  %v2997_v1 = vpop.f32.mrb[1].mxu1  ;;  %v2977_v2 = vpop.f32.mrb[2].mxu0  ;;  %v3767_v61 = vmov 0   ;;  %v3424_v63 = vld [vmem:[#allocation5 + $0x1c0] sm:$0xff]  }
 0x19f   : > { %v2998_v3 = vadd.f32 %v2997_v1, %v2996_v62  ;;  %v2999_v4 = vpop.f32.mrb[2].mxu1  ;;  %v2978_v5 = vpop.f32.mrb[3].mxu0  ;;  %v3423_v62 = vld [vmem:[#allocation5 + $0x140] sm:$0xff]  }
 0x1a0   : > { %v2979_v7 = vadd.f32 %v2978_v5, %v2977_v2  ;;  %v3000_v8 = vpop.f32.mrb[3].mxu1 }
 0x1a1   : > { %v784_v9 = vadd.f32 %v2998_v3, %v2976_v0  ;;  %v3001_v10 = vadd.f32 %v3000_v8, %v2999_v4  ;;  %v437_v0 = vlaneseq }
 0x1a3   : > { %v797_v12 = vmul.f32 %v2794_v6, %v784_v9  ;;  %v787_v13 = vadd.f32 %v3001_v10, %v2979_v7  ;;  %v4113_v1 = vshrl.u32 %v437_v0, 7  ;;  %v3449_v0 = vld [vmem:[#allocation5 + $0x130] sm:$0xff]  }
 0x1a5   : > { %v806_v14 = vadd.f32 %v2795_v11, %v797_v12  ;;  %v798_v15 = vmul.f32 %v2794_v6, %v787_v13  ;;  %vm935_vm1 = vcmp.lt.s32.totalorder %v4113_v1, 4  ;;  %vm938_vm2 = vcmp.ge.s32.totalorder %v4113_v1, 4 }
 0x1a7   : > { %v807_v16 = vadd.f32 %v2795_v11, %v798_v15  ;;  %v808_v17 = vmax.f32 %v806_v14, 0.0 }
 0x1a9   : > { %v809_v18 = vmax.f32 %v807_v16, 0.0 }
 0x1ab   : > { %v810_v20 = vpack.c.bf16 %v809_v18, %v808_v17  ;;  %v439_v17 = vadd.s32 8, %v4113_v1 }
 0x1ad   : > { %3117 = vmatmul.mubr.bf16.vlgmr.msra.gmra.mrb[4].mxu0 %v810_v20  ;;  %3137 = vmatmul.mubr.bf16.vlgmr.msra.gmra.mrb[4].mxu1 %v810_v20  ;;  %vm1146_vm3 = vcmp.lt.s32.totalorder %v439_v17, 12 }
 0x1ae   : > { %3141 = vmatpush3.bf16.msra.mxu0 %v3367_v19  ;;  %3156 = vmatprep.mubr.msk.bf16.mxu0 %vm3766_vm0, %v3765_v39 }
 0x1af   : > { %3142 = vmatprep.subr.bf16.mxu0 %v3765_v39  ;;  %1369 = vmatpush1.bf16.msra.mxu1 %v3375_v28 }
 0x1b0   : > { %1370 = vmatprep.subr.bf16.mxu1 %v3383_v32  ;;  %1400 = vmatprep.mubr.bf16.mxu1 %v3767_v61 }
 0x1b2   : > { %3143 = vmatpush3.bf16.msra.mxu0 %v3368_v21 }
 0x1b3   : > { %3144 = vmatprep.subr.bf16.mxu0 %v3765_v39  ;;  %1371 = vmatpush1.bf16.msra.mxu1 %v3381_v34 }
 0x1b4   : > { %1372 = vmatprep.subr.bf16.mxu1 %v3389_v36 }
 0x1b6   : > { %3145 = vmatpush3.bf16.msra.mxu0 %v3369_v22 }
 0x1b7   : > { %3146 = vmatprep.subr.bf16.mxu0 %v3765_v39  ;;  %1373 = vmatpush1.bf16.msra.mxu1 %v3387_v38  ;;  %v3426_v38 = vld [vmem:[#allocation5 + $0x180] sm:$0xff]  }
 0x1b8   : > { %1374 = vmatprep.subr.bf16.mxu1 %v3395_v41  ;;  %v3427_v41 = vld [vmem:[#allocation5 + $0x148] sm:$0xff]  }
 0x1ba   : > { %3147 = vmatpush3.bf16.msra.mxu0 %v3370_v23 }
 0x1bb   : > { %3148 = vmatprep.subr.bf16.mxu0 %v3765_v39  ;;  %1375 = vmatpush1.bf16.msra.mxu1 %v3393_v43  ;;  %v3429_v43 = vld [vmem:[#allocation5 + $0x108] sm:$0xff]  }
 0x1bc   : > { %1376 = vmatprep.subr.bf16.mxu1 %v3401_v45  ;;  %v3431_v45 = vld [vmem:[#allocation5 + $0x150] sm:$0xff]  }
 0x1be   : > { %3149 = vmatpush3.bf16.msra.mxu0 %v3371_v24 }
 0x1bf   : > { %3150 = vmatprep.subr.bf16.mxu0 %v3765_v39  ;;  %1377 = vmatpush1.bf16.msra.mxu1 %v3399_v47  ;;  %v3433_v47 = vld [vmem:[#allocation5 + $0x110] sm:$0xff]  }
 0x1c0   : > { %1378 = vmatprep.subr.bf16.mxu1 %v3407_v49  ;;  %v3435_v49 = vld [vmem:[#allocation5 + $0x158] sm:$0xff]  }
 0x1c2   : > { %3151 = vmatpush3.bf16.msra.mxu0 %v3372_v25 }
 0x1c3   : > { %3152 = vmatprep.subr.bf16.mxu0 %v3765_v39  ;;  %1379 = vmatpush1.bf16.msra.mxu1 %v3405_v51  ;;  %v3437_v51 = vld [vmem:[#allocation5 + $0x118] sm:$0xff]  }
 0x1c4   : > { %1380 = vmatprep.subr.bf16.mxu1 %v3413_v53  ;;  %v3439_v53 = vld [vmem:[#allocation5 + $0x160] sm:$0xff]  }
 0x1c6   : > { %3153 = vmatpush3.bf16.msra.mxu0 %v3373_v26  ;;  %v2820_v26 = vld [vmem:[%s4311_s6] ss:$0 sm:$0xff] }
 0x1c7   : > { %3154 = vmatprep.subr.bf16.mxu0 %v3765_v39  ;;  %1381 = vmatpush1.bf16.msra.mxu1 %v3411_v55  ;;  %v3441_v55 = vld [vmem:[#allocation5 + $0x120] sm:$0xff]  }
 0x1c8   : > { %1382 = vmatprep.subr.bf16.mxu1 %v3419_v58  ;;  %v3444_v58 = vld [vmem:[#allocation5 + $0x1e8] sm:$0xff]  }
 0x1ca   : > { %3155 = vmatpush3.bf16.msra.mxu0 %v3374_v27 }
 0x1cb   : > { %1411 = vmatprep.subr.bf16.mxu0 %v3380_v31  ;;  %1383 = vmatpush1.bf16.msra.mxu1 %v3417_v57  ;;  %v3443_v57 = vld [vmem:[#allocation5 + $0x168] sm:$0xff]  }
 0x1cc   : > { %3029 = vmatprep.subr.bf16.mxu1 %v3423_v62  ;;  %v3447_v62 = vld [vmem:[#allocation5 + $0x170] sm:$0xff]  }
 0x1cd   : > { %3157 = vmatmul.mubr.bf16.vlgmr.msra.gmra.mrb[8].mxu0 %v810_v20 }
 0x1ce   : > { %1412 = vmatpush1.bf16.msra.mxu0 %v3378_v30  ;;  %1443 = vmatprep.mubr.bf16.mxu0 %v3767_v61  ;;  %v2821_v30 = vld [vmem:[%s4312_s7] ss:$0 sm:$0xff] }
 0x1cf   : > { %1413 = vmatprep.subr.bf16.mxu0 %v3386_v33 }
 0x1d2   : > { %1414 = vmatpush1.bf16.msra.mxu0 %v3384_v35 }
 0x1d3   : > { %1415 = vmatprep.subr.bf16.mxu0 %v3392_v37  ;;  %v3425_v37 = vld [vmem:[#allocation5 + $0x100] sm:$0xff]  }
 0x1d6   : > { %1416 = vmatpush1.bf16.msra.mxu0 %v3390_v40 }
 0x1d7   : > { %1417 = vmatprep.subr.bf16.mxu0 %v3398_v42  ;;  %v3428_v42 = vld [vmem:[#allocation5 + $0x1c8] sm:$0xff]  }
 0x1da   : > { %1418 = vmatpush1.bf16.msra.mxu0 %v3396_v44  ;;  %v3430_v44 = vld [vmem:[#allocation5 + $0x188] sm:$0xff]  }
 0x1db   : > { %1419 = vmatprep.subr.bf16.mxu0 %v3404_v46  ;;  %v3432_v46 = vld [vmem:[#allocation5 + $0x1d0] sm:$0xff]  }
 0x1de   : > { %1420 = vmatpush1.bf16.msra.mxu0 %v3402_v48  ;;  %v3434_v48 = vld [vmem:[#allocation5 + $0x190] sm:$0xff]  }
 0x1df   : > { %1421 = vmatprep.subr.bf16.mxu0 %v3410_v50  ;;  %v3436_v50 = vld [vmem:[#allocation5 + $0x1d8] sm:$0xff]  }
 0x1e2   : > { %1422 = vmatpush1.bf16.msra.mxu0 %v3408_v52  ;;  %v3438_v52 = vld [vmem:[#allocation5 + $0x198] sm:$0xff]  }
 0x1e3   : > { %1423 = vmatprep.subr.bf16.mxu0 %v3416_v54  ;;  %v3440_v54 = vld [vmem:[#allocation5 + $0x1e0] sm:$0xff]  }
 0x1e6   : > { %1424 = vmatpush1.bf16.msra.mxu0 %v3414_v56  ;;  %v3442_v56 = vld [vmem:[#allocation5 + $0x1a0] sm:$0xff]  }
 0x1e7   : > { %1425 = vmatprep.subr.bf16.mxu0 %v3422_v60  ;;  %v3446_v60 = vld [vmem:[#allocation5 + $0x1a8] sm:$0xff]  }
 0x1ea   : > { %1426 = vmatpush1.bf16.msra.mxu0 %v3420_v59  ;;  %v3445_v59 = vld [vmem:[#allocation5 + $0x128] sm:$0xff]  }
 0x1eb   : > { %3051 = vmatprep.subr.bf16.mxu0 %v3424_v63  ;;  %v3448_v63 = vld [vmem:[#allocation5 + $0x1f0] sm:$0xff]  }
 0x280   : > { %v926_v2 = vpop.f32.mrb[4].mxu0  ;;  %v1028_v3 = vpop.f32.mrb[4].mxu1 }
 0x281   : > { %v3118_v4 = vpop.f32.mrb[5].mxu0  ;;  %v3138_v5 = vpop.f32.mrb[5].mxu1  ;;  %v933_v8 = vrot.slane %v926_v2, 4  ;;  %v3450_v2 = vld [vmem:[#allocation5 + $0x1b0] sm:$0xff]  }
 0x282   : > { %v929_v6 = vpop.f32.mrb[6].mxu0  ;;  %v1031_v7 = vpop.f32.mrb[6].mxu1  ;;  %v3452_v4 = vld [vmem:[#allocation5 + $0x1f8] sm:$0xff]  }
 0x283   : > { %v934_v9 = vrot.slane %v929_v6, 4  ;;  %v3119_v10 = vpop.f32.mrb[7].mxu0  ;;  %v3139_v11 = vpop.f32.mrb[7].mxu1  ;;  %v3453_v5 = vld [vmem:[#allocation5 + $0x138] sm:$0xff]  }
 0x284   : > { %v3454_v6 = vld [vmem:[#allocation5 + $0x1b8] sm:$0xff]   ;;  %v4144_v10 = vsub.s32 1, %v4113_v1  ;;  %v4147_v11 = vsub.s32 3, %v4113_v1 }
 0x285   : > { %v937_v12 = vsel %vm935_vm1, %v934_v9, %v933_v8  ;;  %v936_v13 = vsel %vm935_vm1, %v933_v8, %v934_v9  ;;  %v4138_v8 = vsub.s32 2, %v4113_v1  ;;  %v1454_v9 = vld [vmem:[%s4313_s8] sm:$0xf] }
 0x286   : > { %v944_v14 = vsel %vm938_vm2, %v937_v12, 0.0  ;;  %v1032_v15 = vadd.f32 %v1031_v7, %v936_v13  ;;  %v4135_v7 = vsub.s32 0, %v4113_v1  ;;  %v1484_v12 = vld [vmem:[%s4314_s9] sm:$0xf] }
 0x287   : > { %v1029_v16 = vadd.f32 %v1028_v3, %v944_v14  ;;  %v3451_v3 = vld [vmem:[#allocation5 + $0x178] sm:$0xff]   ;;  %v1467_v14 = vrot.slane %v1454_v9, %v4138_v8  ;;  %v1493_v1 = vrot.slane %v1484_v12, %v4144_v10 }
 0x288   : > { %v1459_v13 = vrot.slane %v1454_v9, %v4135_v7  ;;  %v1489_v17 = vrot.slane %v1484_v12, %v4135_v7 }
 0x2a0   : > { %v1134_v18 = vpop.f32.mrb[8].mxu0 }
 0x2a1   : > { %v3158_v19 = vpop.f32.mrb[9].mxu0  ;;  %v1141_v21 = vrot.slane %v1134_v18, 4  ;;  %v1497_v18 = vrot.slane %v1484_v12, %v4138_v8 }
 0x2a2   : > { %v1137_v20 = vpop.f32.mrb[10].mxu0 }
 0x2a3   : > { %v1142_v22 = vrot.slane %v1137_v20, 4  ;;  %v3159_v23 = vpop.f32.mrb[11].mxu0 }
 0x2a5   : > { %v1143_v24 = vsel %vm935_vm1, %v1141_v21, %v1142_v22  ;;  %v1144_v25 = vsel %vm935_vm1, %v1142_v22, %v1141_v21  ;;  %v1501_v21 = vrot.slane %v1484_v12, %v4147_v11 }
 0x2a6   : > { %v1152_v27 = vsel %vm1146_vm3, %v1144_v25, 0.0  ;;  %v1153_v28 = vadd.f32 %v1143_v24, %v1029_v16  ;;  %v1471_v16 = vrot.slane %v1454_v9, %v4147_v11 }
 0x2a7   : > { %v1154_v29 = vadd.f32 %v1152_v27, %v1032_v15  ;;  %v1463_v15 = vrot.slane %v1454_v9, %v4144_v10 }
 0x2a8   : > { %v1162_v31 = vmul.f32 %v2820_v26, %v1153_v28 }
 0x2a9   : > { %v1163_v32 = vmul.f32 %v2820_v26, %v1154_v29 }
 0x2aa   : > { %v1171_v33 = vadd.f32 %v2821_v30, %v1162_v31 }
 0x2ab   : > { %v1172_v34 = vadd.f32 %v2821_v30, %v1163_v32 }
 0x2ac   : > { %v1173_v35 = vmax.f32 %v1171_v33, 0.0 }
 0x2ad   : > { %v1174_v36 = vmax.f32 %v1172_v34, 0.0 }
 0x2af   : > { %v1175_v40 = vpack.c.bf16 %v1174_v36, %v1173_v35 }
 0x2b1   : > { %1401 = vmatmul.mubr.bf16.vlgmr.msra.gmra.mrb[8].mxu1 %v1175_v40  ;;  %1444 = vmatmul.mubr.bf16.vlgmr.msra.gmra.mrb[12].mxu0 %v1175_v40 }
 0x2b2   : > { %3030 = vmatpush3.bf16.msra.mxu1 %v3425_v37  ;;  %3052 = vmatpush3.bf16.msra.mxu0 %v3426_v38 }
 0x2b3   : > { %3031 = vmatprep.subr.bf16.mxu1 %v3427_v41  ;;  %3053 = vmatprep.subr.bf16.mxu0 %v3428_v42 }
 0x2b6   : > { %3032 = vmatpush3.bf16.msra.mxu1 %v3429_v43  ;;  %3054 = vmatpush3.bf16.msra.mxu0 %v3430_v44 }
 0x2b7   : > { %3033 = vmatprep.subr.bf16.mxu1 %v3431_v45  ;;  %3055 = vmatprep.subr.bf16.mxu0 %v3432_v46 }
 0x2ba   : > { %3034 = vmatpush3.bf16.msra.mxu1 %v3433_v47  ;;  %3056 = vmatpush3.bf16.msra.mxu0 %v3434_v48 }
 0x2bb   : > { %3035 = vmatprep.subr.bf16.mxu1 %v3435_v49  ;;  %3057 = vmatprep.subr.bf16.mxu0 %v3436_v50 }
 0x2be   : > { %3036 = vmatpush3.bf16.msra.mxu1 %v3437_v51  ;;  %3058 = vmatpush3.bf16.msra.mxu0 %v3438_v52 }
 0x2bf   : > { %3037 = vmatprep.subr.bf16.mxu1 %v3439_v53  ;;  %3059 = vmatprep.subr.bf16.mxu0 %v3440_v54  ;;  %v3527_v53 = vld [vmem:[%s4056_s25 + $0x20] sm:$0xff] }
 0x2c2   : > { %3038 = vmatpush3.bf16.msra.mxu1 %v3441_v55  ;;  %3060 = vmatpush3.bf16.msra.mxu0 %v3442_v56  ;;  %v3528_v55 = vld [vmem:[%s4056_s25 + $0x30] sm:$0xff] }
 0x2c3   : > { %3039 = vmatprep.subr.bf16.mxu1 %v3443_v57  ;;  %3061 = vmatprep.subr.bf16.mxu0 %v3444_v58  ;;  %v3529_v57 = vld [vmem:[%s4056_s25 + $0x8] sm:$0xff] }
 0x2c6   : > { %3040 = vmatpush3.bf16.msra.mxu1 %v3445_v59  ;;  %3062 = vmatpush3.bf16.msra.mxu0 %v3446_v60  ;;  %v3530_v59 = vld [vmem:[%s4056_s25 + $0x18] sm:$0xff] }
 0x2c7   : > { %3041 = vmatprep.subr.bf16.mxu1 %v3447_v62  ;;  %3063 = vmatprep.subr.bf16.mxu0 %v3448_v63  ;;  %v3531_v62 = vld [vmem:[%s4056_s25 + $0x28] sm:$0xff] }
 0x2ca   : > { %3042 = vmatpush3.bf16.msra.mxu1 %v3449_v0  ;;  %3064 = vmatpush3.bf16.msra.mxu0 %v3450_v2  ;;  %v3532_v0 = vld [vmem:[%s4056_s25 + $0x38] sm:$0xff] }
 0x2cb   : > { %3043 = vmatprep.subr.bf16.mxu1 %v3451_v3  ;;  %3065 = vmatprep.subr.bf16.mxu0 %v3452_v4  ;;  %v3533_v3 = vld [vmem:[%s4056_s25] sm:$0xff] }
 0x2ce   : > { %3044 = vmatpush3.bf16.msra.mxu1 %v3453_v5  ;;  %3066 = vmatpush3.bf16.msra.mxu0 %v3454_v6  ;;  %v3534_v5 = vld [vmem:[%s4056_s25 + $0x10] sm:$0xff]  ;;  %s2621_s25 = scalar_lea.sflag [#allocation4], %s4050_s23 }
 0x2cf   : > { %3160 = vmatprep.subr.bf16.mxu1 %v3765_v39  ;;  %3180 = vmatprep.subr.bf16.mxu0 %v3765_v39 }
 0x384   : > { %v1402_v19 = vpop.f32.mrb[8].mxu1  ;;  %v1445_v20 = vpop.f32.mrb[12].mxu0 }
 0x385   : > { %v1476_v22 = vmul.f32 %v1459_v13, %v1402_v19  ;;  %v1478_v23 = vmul.f32 %v1467_v14, %v1445_v20  ;;  %v1404_v24 = vpop.f32.mrb[9].mxu1  ;;  %v1447_v25 = vpop.f32.mrb[13].mxu0  ;;  %v3459_v19 = vld [vmem:[#allocation7 + $0xd0] sm:$0xff]  }
 0x386   : > { %v1477_v26 = vmul.f32 %v1463_v15, %v1404_v24  ;;  %v1479_v27 = vmul.f32 %v1471_v16, %v1447_v25  ;;  %v1406_v28 = vpop.f32.mrb[10].mxu1  ;;  %v1449_v29 = vpop.f32.mrb[14].mxu0  ;;  %v3460_v20 = vld [vmem:[#allocation7 + $0x110] sm:$0xff]   ;;  %v3465_v24 = vld [vmem:[#allocation7 + $0xe8] sm:$0xff]  }
 0x387   : > { %v1506_v30 = vadd.f32 %v1489_v17, %v1476_v22  ;;  %v1508_v31 = vadd.f32 %v1497_v18, %v1478_v23  ;;  %v1480_v32 = vmul.f32 %v1459_v13, %v1406_v28  ;;  %v1482_v33 = vmul.f32 %v1467_v14, %v1449_v29  ;;  %v1408_v34 = vpop.f32.mrb[11].mxu1  ;;  %v1451_v35 = vpop.f32.mrb[15].mxu0  ;;  %v3455_v13 = vld [vmem:[#allocation7 + $0xc0] sm:$0xff]   ;;  %v3466_v25 = vld [vmem:[#allocation7 + $0x128] sm:$0xff]   ;;  %v3469_v28 = vld [vmem:[#allocation7 + $0xf8] sm:$0xff]  }
 0x388   : > { %v1507_v36 = vadd.f32 %v1493_v1, %v1477_v26  ;;  %v1509_v37 = vadd.f32 %v1501_v21, %v1479_v27  ;;  %v1481_v38 = vmul.f32 %v1463_v15, %v1408_v34  ;;  %v1483_v40 = vmul.f32 %v1471_v16, %v1451_v35  ;;  %v3456_v14 = vld [vmem:[#allocation7 + $0x100] sm:$0xff]   ;;  %v3467_v26 = vld [vmem:[#allocation7 + $0xf0] sm:$0xff]   ;;  %v3470_v29 = vld [vmem:[#allocation7 + $0x138] sm:$0xff]  }
 0x389   : > { %v1510_v41 = vadd.f32 %v1489_v17, %v1480_v32  ;;  %v1512_v42 = vadd.f32 %v1497_v18, %v1482_v33  ;;  %v1514_v47 = vmax.f32 %v1506_v30, 0.0  ;;  %v1516_v48 = vmax.f32 %v1508_v31, 0.0  ;;  %v3457_v17 = vld [vmem:[#allocation7 + $0xc8] sm:$0xff]   ;;  %v3463_v22 = vld [vmem:[#allocation7 + $0xe0] sm:$0xff]   ;;  %v3468_v27 = vld [vmem:[#allocation7 + $0x130] sm:$0xff]  }
 0x38a   : > { %v1515_v43 = vmax.f32 %v1507_v36, 0.0  ;;  %v1517_v44 = vmax.f32 %v1509_v37, 0.0  ;;  %v1511_v45 = vadd.f32 %v1493_v1, %v1481_v38  ;;  %v1513_v46 = vadd.f32 %v1501_v21, %v1483_v40  ;;  %v3458_v18 = vld [vmem:[#allocation7 + $0x108] sm:$0xff]   ;;  %v3461_v1 = vld [vmem:[#allocation7 + $0xd8] sm:$0xff]   ;;  %v3464_v23 = vld [vmem:[#allocation7 + $0x120] sm:$0xff]  }
 0x38b   : > { %v1518_v49 = vmax.f32 %v1510_v41, 0.0  ;;  %v1520_v50 = vmax.f32 %v1512_v42, 0.0  ;;  %v4179_v4 = vadd.f32 %v3533_v3, %v1514_v47  ;;  %v4182_v6 = vadd.f32 %v3534_v5, %v1516_v48  ;;  %v3462_v21 = vld [vmem:[#allocation7 + $0x118] sm:$0xff]   ;;  %v2887_v38 = vld [vmem:[%s4309_s4 + $0x1] ss:$0 sm:$0xff]  ;;  %v3476_v3 = vld [vmem:[#allocation7 + $0x168] sm:$0xff]  }
 0x38c   : > { %v1519_v51 = vmax.f32 %v1511_v45, 0.0  ;;  %v1521_v52 = vmax.f32 %v1513_v46, 0.0  ;;  %v4167_v58 = vadd.f32 %v3529_v57, %v1515_v43  ;;  %v4170_v60 = vadd.f32 %v3530_v59, %v1517_v44  ;;  %v2888_v45 = vld [vmem:[#allocation10 + $0x1] ss:$0 sm:$0xff]  ;;  %v3472_v57 = vld [vmem:[#allocation7 + $0x148] sm:$0xff]   ;;  %v3473_v59 = vld [vmem:[#allocation7 + $0x150] sm:$0xff]  }
 0x38d   : > { %v4161_v54 = vadd.f32 %v3527_v53, %v1518_v49  ;;  %v4164_v56 = vadd.f32 %v3528_v55, %v1520_v50  ;;  %v3471_v53 = vld [vmem:[#allocation7 + $0x140] sm:$0xff]   ;;  %v3477_v5 = vld [vmem:[#allocation7 + $0x170] sm:$0xff]  }
 0x38e   : > { %v4173_v63 = vadd.f32 %v3531_v62, %v1519_v51  ;;  %v4176_v2 = vadd.f32 %v3532_v0, %v1521_v52  ;;  %v3474_v62 = vld [vmem:[#allocation7 + $0x158] sm:$0xff]   ;;  %v3475_v0 = vld [vmem:[#allocation7 + $0x160] sm:$0xff]  }
 0x38f   : > { %v1530_v15 = vpack.c.bf16 %v4161_v54, %v4179_v4  ;;  %v1532_v16 = vpack.c.bf16 %v4164_v56, %v4182_v6 }
 0x390   : > { %v1531_v9 = vpack.c.bf16 %v4173_v63, %v4167_v58  ;;  %v1533_v12 = vpack.c.bf16 %v4176_v2, %v4170_v60 }
 0x392   : > { %1823 = vmatprep.mubr.bf16.mxu1 %v1531_v9  ;;  %1864 = vmatprep.mubr.bf16.mxu0 %v1533_v12  ;;  %v3478_v9 = vld [vmem:[#allocation7 + $0x178] sm:$0xff]   ;;  %v3479_v12 = vld [vmem:[#allocation8 + $0x100] ss:$16 sps:$4 sm:$0xff]  }
 0x393   : > { %1824 = vmatmul.mubr.bf16.vlgmr.msra.gmra.mrb[12].mxu1 %v1530_v15  ;;  %1865 = vmatmul.mubr.bf16.vlgmr.msra.gmra.mrb[16].mxu0 %v1532_v16  ;;  %v3484_v15 = vld [vmem:[#allocation8 + $0x10c] ss:$16 sps:$4 sm:$0xff]   ;;  %v3487_v16 = vld [vmem:[#allocation8 + $0x124] ss:$16 sps:$4 sm:$0xff]  }
 0x394   : > { %3161 = vmatpush3.bf16.msra.mxu1 %v3455_v13  ;;  %3181 = vmatpush3.bf16.msra.mxu0 %v3456_v14  ;;  %v3481_v13 = vld [vmem:[#allocation8 + $0x104] ss:$16 sps:$4 sm:$0xff]   ;;  %v3482_v14 = vld [vmem:[#allocation8 + $0x108] ss:$16 sps:$4 sm:$0xff]  }
 0x395   : > { %3162 = vmatprep.subr.bf16.mxu1 %v3765_v39  ;;  %3182 = vmatprep.subr.bf16.mxu0 %v3765_v39 }
 0x396   : > { %3176 = vmatprep.mubr.msk.bf16.mxu1 %vm3766_vm0, %v3765_v39  ;;  %3196 = vmatprep.mubr.msk.bf16.mxu0 %vm3766_vm0, %v3765_v39 }
 0x398   : > { %3163 = vmatpush3.bf16.msra.mxu1 %v3457_v17  ;;  %3183 = vmatpush3.bf16.msra.mxu0 %v3458_v18  ;;  %v3490_v17 = vld [vmem:[#allocation8 + $0x12c] ss:$16 sps:$4 sm:$0xff]   ;;  %v3485_v18 = vld [vmem:[#allocation8 + $0x120] ss:$16 sps:$4 sm:$0xff]  }
 0x399   : > { %3164 = vmatprep.subr.bf16.mxu1 %v3765_v39  ;;  %3184 = vmatprep.subr.bf16.mxu0 %v3765_v39 }
 0x39c   : > { %3165 = vmatpush3.bf16.msra.mxu1 %v3459_v19  ;;  %3185 = vmatpush3.bf16.msra.mxu0 %v3460_v20  ;;  %v3488_v19 = vld [vmem:[#allocation8 + $0x128] ss:$16 sps:$4 sm:$0xff]   ;;  %v3493_v20 = vld [vmem:[#allocation8 + $0x144] ss:$16 sps:$4 sm:$0xff]  }
 0x39d   : > { %3166 = vmatprep.subr.bf16.mxu1 %v3765_v39  ;;  %3186 = vmatprep.subr.bf16.mxu0 %v3765_v39 }
 0x3a0   : > { %3167 = vmatpush3.bf16.msra.mxu1 %v3461_v1  ;;  %3187 = vmatpush3.bf16.msra.mxu0 %v3462_v21  ;;  %v3491_v1 = vld [vmem:[#allocation8 + $0x140] ss:$16 sps:$4 sm:$0xff]   ;;  %v3499_v21 = vld [vmem:[#allocation8 + $0x164] ss:$16 sps:$4 sm:$0xff]  }
 0x3a1   : > { %3168 = vmatprep.subr.bf16.mxu1 %v3765_v39  ;;  %3188 = vmatprep.subr.bf16.mxu0 %v3765_v39 }
 0x3a4   : > { %3169 = vmatpush3.bf16.msra.mxu1 %v3463_v22  ;;  %3189 = vmatpush3.bf16.msra.mxu0 %v3464_v23  ;;  %v3502_v22 = vld [vmem:[#allocation8 + $0x16c] ss:$16 sps:$4 sm:$0xff]   ;;  %v3497_v23 = vld [vmem:[#allocation8 + $0x160] ss:$16 sps:$4 sm:$0xff]  }
 0x3a5   : > { %3170 = vmatprep.subr.bf16.mxu1 %v3765_v39  ;;  %3190 = vmatprep.subr.bf16.mxu0 %v3765_v39 }
 0x3a8   : > { %3171 = vmatpush3.bf16.msra.mxu1 %v3465_v24  ;;  %3191 = vmatpush3.bf16.msra.mxu0 %v3466_v25  ;;  %v3500_v24 = vld [vmem:[#allocation8 + $0x168] ss:$16 sps:$4 sm:$0xff]   ;;  %v3505_v25 = vld [vmem:[#allocation8 + $0x184] ss:$16 sps:$4 sm:$0xff]  }
 0x3a9   : > { %3172 = vmatprep.subr.bf16.mxu1 %v3765_v39  ;;  %3192 = vmatprep.subr.bf16.mxu0 %v3765_v39 }
 0x3ac   : > { %3173 = vmatpush3.bf16.msra.mxu1 %v3467_v26  ;;  %3193 = vmatpush3.bf16.msra.mxu0 %v3468_v27  ;;  %v3508_v26 = vld [vmem:[#allocation8 + $0x18c] ss:$16 sps:$4 sm:$0xff]   ;;  %v3503_v27 = vld [vmem:[#allocation8 + $0x180] ss:$16 sps:$4 sm:$0xff]  }
 0x3ad   : > { %3174 = vmatprep.subr.bf16.mxu1 %v3765_v39  ;;  %3194 = vmatprep.subr.bf16.mxu0 %v3765_v39 }
 0x3b0   : > { %3175 = vmatpush3.bf16.msra.mxu1 %v3469_v28  ;;  %3195 = vmatpush3.bf16.msra.mxu0 %v3470_v29  ;;  %v3506_v28 = vld [vmem:[#allocation8 + $0x188] ss:$16 sps:$4 sm:$0xff]   ;;  %v3511_v29 = vld [vmem:[#allocation8 + $0x1a4] ss:$16 sps:$4 sm:$0xff]  }
 0x3b1   : > { %3200 = vmatprep.subr.bf16.mxu1 %v3765_v39  ;;  %2448 = vmatprep.subr.bf16.mxu0 %v3481_v13 }
 0x466   : > { %v3045_v30 = vpop.f32.mrb[12].mxu1  ;;  %v3067_v31 = vpop.f32.mrb[16].mxu0 }
 0x467   : > { %v3046_v32 = vpop.f32.mrb[13].mxu1  ;;  %v3068_v33 = vpop.f32.mrb[17].mxu0 }
 0x468   : > { %v3047_v34 = vadd.f32 %v3046_v32, %v3045_v30  ;;  %v3069_v35 = vadd.f32 %v3068_v33, %v3067_v31  ;;  %v3048_v36 = vpop.f32.mrb[14].mxu1  ;;  %v3070_v37 = vpop.f32.mrb[18].mxu0  ;;  %v3514_v30 = vld [vmem:[#allocation8 + $0x1ac] ss:$16 sps:$4 sm:$0xff]   ;;  %v3509_v31 = vld [vmem:[#allocation8 + $0x1a0] ss:$16 sps:$4 sm:$0xff]  }
 0x469   : > { %v3049_v40 = vpop.f32.mrb[15].mxu1  ;;  %v3071_v41 = vpop.f32.mrb[19].mxu0  ;;  %v3512_v32 = vld [vmem:[#allocation8 + $0x1a8] ss:$16 sps:$4 sm:$0xff]   ;;  %v3517_v33 = vld [vmem:[#allocation8 + $0x1c4] ss:$16 sps:$4 sm:$0xff]  }
 0x46a   : > { %v1867_v42 = vadd.f32 %v3069_v35, %v3047_v34  ;;  %v3050_v43 = vadd.f32 %v3049_v40, %v3048_v36  ;;  %v3072_v44 = vadd.f32 %v3071_v41, %v3070_v37  ;;  %v3520_v34 = vld [vmem:[#allocation8 + $0x1cc] ss:$16 sps:$4 sm:$0xff]   ;;  %v3515_v35 = vld [vmem:[#allocation8 + $0x1c0] ss:$16 sps:$4 sm:$0xff]   ;;  %v3518_v36 = vld [vmem:[#allocation8 + $0x1c8] ss:$16 sps:$4 sm:$0xff]  }
 0x46b   : > { %v3523_v37 = vld [vmem:[#allocation8 + $0x1e4] ss:$16 sps:$4 sm:$0xff]   ;;  %v3521_v40 = vld [vmem:[#allocation8 + $0x1e0] ss:$16 sps:$4 sm:$0xff]   ;;  %v3524_v41 = vld [vmem:[#allocation8 + $0x1e8] ss:$16 sps:$4 sm:$0xff]  }
 0x46c   : > { %v1881_v46 = vmul.f32 %v2887_v38, %v1867_v42  ;;  %v1870_v47 = vadd.f32 %v3072_v44, %v3050_v43 }
 0x46e   : > { %v1891_v48 = vadd.f32 %v2888_v45, %v1881_v46  ;;  %v1882_v49 = vmul.f32 %v2887_v38, %v1870_v47  ;;  %v3526_v38 = vld [vmem:[#allocation8 + $0x1ec] ss:$16 sps:$4 sm:$0xff]  }
 0x470   : > { %v1892_v50 = vadd.f32 %v2888_v45, %v1882_v49  ;;  %v1893_v51 = vmax.f32 %v1891_v48, 0.0 }
 0x472   : > { %v1894_v52 = vmax.f32 %v1892_v50, 0.0 }
 0x474   : > { %v1895_v55 = vpack.c.bf16 %v1894_v52, %v1893_v51  ;;  %v2914_v51 = vld [vmem:[%s4311_s6 + $0x1] ss:$0 sm:$0xff] }
 0x476   : > { %3177 = vmatmul.mubr.bf16.vlgmr.msra.gmra.mrb[16].mxu1 %v1895_v55  ;;  %3197 = vmatmul.mubr.bf16.vlgmr.msra.gmra.mrb[20].mxu0 %v1895_v55 }
 0x477   : > { %3201 = vmatpush3.bf16.msra.mxu1 %v3471_v53  ;;  %3216 = vmatprep.mubr.msk.bf16.mxu1 %vm3766_vm0, %v3765_v39 }
 0x478   : > { %3202 = vmatprep.subr.bf16.mxu1 %v3765_v39  ;;  %2480 = vmatprep.mubr.bf16.mxu0 %v3767_v61 }
 0x479   : > { %2449 = vmatpush1.bf16.msra.mxu0 %v3479_v12 }
 0x47a   : > { %2450 = vmatprep.subr.bf16.mxu0 %v3487_v16  ;;  %v2950_v16 = vld [vmem:[%s4314_s9 + $0x4] sm:$0xf] }
 0x47b   : > { %3203 = vmatpush3.bf16.msra.mxu1 %v3472_v57  ;;  %v2916_v57 = vld [vmem:[%s4312_s7 + $0x1] ss:$0 sm:$0xff] }
 0x47c   : > { %3204 = vmatprep.subr.bf16.mxu1 %v3765_v39 }
 0x47d   : > { %2451 = vmatpush1.bf16.msra.mxu0 %v3485_v18 }
 0x47e   : > { %2452 = vmatprep.subr.bf16.mxu0 %v3493_v20 }
 0x47f   : > { %3205 = vmatpush3.bf16.msra.mxu1 %v3473_v59 }
 0x480   : > { %3206 = vmatprep.subr.bf16.mxu1 %v3765_v39 }
 0x481   : > { %2453 = vmatpush1.bf16.msra.mxu0 %v3491_v1  ;;  %v2579_v1 = vrot.slane %v2950_v16, %v4138_v8 }
 0x482   : > { %2454 = vmatprep.subr.bf16.mxu0 %v3499_v21 }
 0x483   : > { %3207 = vmatpush3.bf16.msra.mxu1 %v3474_v62 }
 0x484   : > { %3208 = vmatprep.subr.bf16.mxu1 %v3765_v39 }
 0x485   : > { %2455 = vmatpush1.bf16.msra.mxu0 %v3497_v23  ;;  %v2583_v23 = vrot.slane %v2950_v16, %v4147_v11 }
 0x486   : > { %2456 = vmatprep.subr.bf16.mxu0 %v3505_v25 }
 0x487   : > { %3209 = vmatpush3.bf16.msra.mxu1 %v3475_v0 }
 0x488   : > { %3210 = vmatprep.subr.bf16.mxu1 %v3765_v39 }
 0x489   : > { %2457 = vmatpush1.bf16.msra.mxu0 %v3503_v27 }
 0x48a   : > { %2458 = vmatprep.subr.bf16.mxu0 %v3511_v29 }
 0x48b   : > { %3211 = vmatpush3.bf16.msra.mxu1 %v3476_v3 }
 0x48c   : > { %3212 = vmatprep.subr.bf16.mxu1 %v3765_v39 }
 0x48d   : > { %2459 = vmatpush1.bf16.msra.mxu0 %v3509_v31 }
 0x48e   : > { %2460 = vmatprep.subr.bf16.mxu0 %v3517_v33 }
 0x48f   : > { %3213 = vmatpush3.bf16.msra.mxu1 %v3477_v5 }
 0x490   : > { %3214 = vmatprep.subr.bf16.mxu1 %v3765_v39  ;;  %v3496_v39 = vld [vmem:[#allocation8 + $0x14c] ss:$16 sps:$4 sm:$0xff]  }
 0x491   : > { %2461 = vmatpush1.bf16.msra.mxu0 %v3515_v35 }
 0x492   : > { %2462 = vmatprep.subr.bf16.mxu0 %v3523_v37 }
 0x493   : > { %3215 = vmatpush3.bf16.msra.mxu1 %v3478_v9 }
 0x494   : > { %2491 = vmatprep.subr.bf16.mxu1 %v3484_v15  ;;  %v2949_v15 = vld [vmem:[%s4313_s8 + $0x4] sm:$0xf] }
 0x495   : > { %2463 = vmatpush1.bf16.msra.mxu0 %v3521_v40  ;;  %v2548_v18 = vrot.slane %v2949_v15, %v4138_v8  ;;  %v2552_v20 = vrot.slane %v2949_v15, %v4147_v11 }
 0x496   : > { %3217 = vmatmul.mubr.bf16.vlgmr.msra.gmra.mrb[20].mxu1 %v1895_v55 }
 0x497   : > { %2523 = vmatprep.mubr.bf16.mxu1 %v3767_v61  ;;  %2492 = vmatpush1.bf16.msra.mxu1 %v3482_v14  ;;  %v3494_v61 = vld [vmem:[#allocation8 + $0x148] ss:$16 sps:$4 sm:$0xff]  }
 0x498   : > { %2493 = vmatprep.subr.bf16.mxu1 %v3490_v17  ;;  %v2540_v17 = vrot.slane %v2949_v15, %v4135_v7 }
 0x49b   : > { %2494 = vmatpush1.bf16.msra.mxu1 %v3488_v19  ;;  %v2544_v19 = vrot.slane %v2949_v15, %v4144_v10 }
 0x49c   : > { %2495 = vmatprep.subr.bf16.mxu1 %v3496_v39  ;;  %v2571_v39 = vrot.slane %v2950_v16, %v4135_v7 }
 0x49f   : > { %2496 = vmatpush1.bf16.msra.mxu1 %v3494_v61 }
 0x4a0   : > { %2497 = vmatprep.subr.bf16.mxu1 %v3502_v22  ;;  %v2575_v22 = vrot.slane %v2950_v16, %v4144_v10 }
 0x4a3   : > { %2498 = vmatpush1.bf16.msra.mxu1 %v3500_v24 }
 0x4a4   : > { %2499 = vmatprep.subr.bf16.mxu1 %v3508_v26 }
 0x4a7   : > { %2500 = vmatpush1.bf16.msra.mxu1 %v3506_v28 }
 0x4a8   : > { %2501 = vmatprep.subr.bf16.mxu1 %v3514_v30 }
 0x4ab   : > { %2502 = vmatpush1.bf16.msra.mxu1 %v3512_v32 }
 0x4ac   : > { %2503 = vmatprep.subr.bf16.mxu1 %v3520_v34 }
 0x4af   : > { %2504 = vmatpush1.bf16.msra.mxu1 %v3518_v36 }
 0x4b0   : > { %2505 = vmatprep.subr.bf16.mxu1 %v3526_v38 }
 0x4b3   : > { %2506 = vmatpush1.bf16.msra.mxu1 %v3524_v41 }
 0x549   : > { %v2012_v42 = vpop.f32.mrb[16].mxu1  ;;  %v2109_v43 = vpop.f32.mrb[20].mxu0 }
 0x54a   : > { %v3178_v44 = vpop.f32.mrb[17].mxu1  ;;  %v3198_v45 = vpop.f32.mrb[21].mxu0 }
 0x54b   : > { %v2015_v46 = vpop.f32.mrb[18].mxu1  ;;  %v2112_v47 = vpop.f32.mrb[22].mxu0 }
 0x54c   : > { %v2113_v48 = vadd.f32 %v2112_v47, %v2012_v42  ;;  %v3179_v49 = vpop.f32.mrb[19].mxu1  ;;  %v3199_v50 = vpop.f32.mrb[23].mxu0 }
 0x54e   : > { %v2241_v53 = vmul.f32 %v2914_v51, %v2113_v48 }
 0x550   : > { %v2251_v3 = vadd.f32 %v2916_v57, %v2241_v53 }
 0x552   : > { %v2253_v12 = vmax.f32 %v2251_v3, 0.0 }
 0x569   : > { %v2215_v52 = vpop.f32.mrb[20].mxu1 }
 0x56a   : > { %v3218_v55 = vpop.f32.mrb[21].mxu1 }
 0x56b   : > { %v2218_v59 = vpop.f32.mrb[22].mxu1 }
 0x56c   : > { %v2230_v62 = vadd.f32 %v2218_v59, %v2109_v43  ;;  %v3219_v0 = vpop.f32.mrb[23].mxu1 }
 0x56e   : > { %v2240_v5 = vmul.f32 %v2914_v51, %v2230_v62 }
 0x570   : > { %v2250_v9 = vadd.f32 %v2916_v57, %v2240_v5 }
 0x572   : > { %v2252_v13 = vmax.f32 %v2250_v9, 0.0 }
 0x574   : > { %v2254_v14 = vpack.c.bf16 %v2253_v12, %v2252_v13 }
 0x576   : > { %2481 = vmatmul.mubr.bf16.vlgmr.msra.gmra.mrb[24].mxu0 %v2254_v14  ;;  %2524 = vmatmul.mubr.bf16.vlgmr.msra.gmra.mrb[24].mxu1 %v2254_v14 }
 0x649   : > { %v2482_v61 = vpop.f32.mrb[24].mxu0  ;;  %v2525_v21 = vpop.f32.mrb[24].mxu1 }
 0x64a   : > { %v2557_v24 = vmul.f32 %v2540_v17, %v2482_v61  ;;  %v2559_v25 = vmul.f32 %v2548_v18, %v2525_v21  ;;  %v2484_v26 = vpop.f32.mrb[25].mxu0  ;;  %v2527_v27 = vpop.f32.mrb[25].mxu1 }
 0x64b   : > { %v2558_v28 = vmul.f32 %v2544_v19, %v2484_v26  ;;  %v2560_v29 = vmul.f32 %v2552_v20, %v2527_v27  ;;  %v2486_v30 = vpop.f32.mrb[26].mxu0  ;;  %v2529_v31 = vpop.f32.mrb[26].mxu1 }
 0x64c   : > { %v2588_v32 = vadd.f32 %v2571_v39, %v2557_v24  ;;  %v2590_v33 = vadd.f32 %v2579_v1, %v2559_v25  ;;  %v2561_v34 = vmul.f32 %v2540_v17, %v2486_v30  ;;  %v2563_v7 = vmul.f32 %v2548_v18, %v2529_v31  ;;  %v2488_v8 = vpop.f32.mrb[27].mxu0  ;;  %v2531_v35 = vpop.f32.mrb[27].mxu1 }
 0x64d   : > { %v2589_v36 = vadd.f32 %v2575_v22, %v2558_v28  ;;  %v2591_v10 = vadd.f32 %v2583_v23, %v2560_v29  ;;  %v2562_v37 = vmul.f32 %v2544_v19, %v2488_v8  ;;  %v2564_v11 = vmul.f32 %v2552_v20, %v2531_v35 }
 0x64e   : > { %v2596_v38 = vmax.f32 %v2588_v32, 0.0  ;;  %v2598_v40 = vmax.f32 %v2590_v33, 0.0  ;;  %v2592_v41 = vadd.f32 %v2571_v39, %v2561_v34  ;;  %v2594_v42 = vadd.f32 %v2579_v1, %v2563_v7 }
 0x64f   : > { %v2597_v43 = vmax.f32 %v2589_v36, 0.0  ;;  %v2599_v44 = vmax.f32 %v2591_v10, 0.0  ;;  %v2593_v45 = vadd.f32 %v2575_v22, %v2562_v37  ;;  %v2595_v46 = vadd.f32 %v2583_v23, %v2564_v11 }
 0x650   : > { %v2604_v47 = vadd.f32 %v2596_v38, %v4179_v4  ;;  %v2606_v48 = vadd.f32 %v2598_v40, %v4182_v6  ;;  %v2600_v49 = vmax.f32 %v2592_v41, 0.0  ;;  %v2602_v50 = vmax.f32 %v2594_v42, 0.0 }
 0x651   : > { %v2605_v51 = vadd.f32 %v2597_v43, %v4167_v58  ;;  %v2607_v52 = vadd.f32 %v2599_v44, %v4170_v60  ;;  %v2601_v53 = vmax.f32 %v2593_v45, 0.0  ;;  %v2603_v55 = vmax.f32 %v2595_v46, 0.0 }
 0x652   : > { %2612 = vst [vmem:[%s435_s24] sm:$0xff] %v2604_v47  ;;  %2614 = vst [vmem:[%s435_s24 + $0x10] sm:$0xff] %v2606_v48  ;;  %v2608_v57 = vadd.f32 %v2600_v49, %v4161_v54  ;;  %v2610_v59 = vadd.f32 %v2602_v50, %v4164_v56 }
 0x653   : > { %2613 = vst [vmem:[%s435_s24 + $0x8] sm:$0xff] %v2605_v51  ;;  %2615 = vst [vmem:[%s435_s24 + $0x18] sm:$0xff] %v2607_v52  ;;  %v2609_v58 = vadd.f32 %v2601_v53, %v4173_v63  ;;  %v2611_v60 = vadd.f32 %v2603_v55, %v4176_v2 }
 0x654   : > { %2616 = vst [vmem:[%s435_s24 + $0x20] sm:$0xff] %v2608_v57  ;;  %2618 = vst [vmem:[%s435_s24 + $0x30] sm:$0xff] %v2610_v59 }
 0x655   : > { %2617 = vst [vmem:[%s435_s24 + $0x28] sm:$0xff] %v2609_v58  ;;  %2619 = vst [vmem:[%s435_s24 + $0x38] sm:$0xff] %v2611_v60 }
 0x656   : > { %3690 = shalt.err (!%p3687_p13)
}
 0x657   : > { %s3691_s1 = scalar_lea.hbm %s4257_s22, 1024  ;;  %s3695_s20 = scalar_lea.hbm %s4345_s27, 2048 }
 0x658   : > { %p3692_p9 = scmp.ne.s32.totalorder %s4257_s22, %s3691_s1  ;;  %p3696_p6 = scmp.lt.u32.totalorder %s4257_s22, %s4345_s27 }
 0x659   : > { %p3697_p4 = scmp.lt.u32.totalorder %s3695_s20, %s3691_s1  ;;  %p3699_p10 = scmp.lt.u32.totalorder %s3691_s1, %s4257_s22 }
 0x65a   : > { %p3693_p0 = pnand %p3692_p9, %p4002_p5 }
 0x65b   : > { %p3698_p8 = por %p3697_p4, %p3696_p6 }
 0x65c   : > { %p3694_p11 = pneg %p3693_p0 }
 0x65d   : > { %p3700_p3 = por %p3699_p10, %p3698_p8 }
 0x65f   : > { %p3701_p7 = pnand %p3700_p3, %p3694_p11 }
 0x661   : > { %3704 = shalt.err (!%p3701_p7)
}
 0x662   : > { %s3769_s10 = smov 512   ;;  %s3770_s19 = smov 32  }
 0x663   : > { %3238 = dma.vmem_to_hbm [thread:$0]  (%p4002_p5), %s4259_s29, 1024, %s4257_s22, %s2621_s25, %s3769_s10, %s3769_s10, %s3770_s19  }
 0x664 PF: > { %s4346_s21 = sld [smem:[#allocation16_spill]]  ;;  %s4347_s26 = sld [smem:[#allocation17_spill]] }
 0x665   : > { %p4349_p1 = scmp.ge.s32.totalorder %s3751_s16, 2 }
 0x66a   : > { %s2649_s11 = sand.u32 1, %s4346_s21   ;;  %p4348_p12 = scmp.ne.s32.totalorder %s4347_s26, 0 }
 0x66b   : > { %s2650_s1 = scalar_lea.sflag [#allocation4], %s2649_s11 }
 0x66c   : > { %p3258_p2 = pnand %p4349_p1, %p4348_p12 }
 0x66e   : > { %3734 = dma.done.wait (!%p3258_p2), %s2650_s1, 1024  }
 0x66f   : > { %3736 = vsyncadd (!%p3258_p2), %s2650_s1, 4294966272  ;;  %p25_p13 = scmp.ge.s32.totalorder %s3988_s12, 4   ;;  %s4350_s13 = smov %s3743_s14 }
 0x670   : > { %s4351_s14 = smov %s3747_s15  ;;  %s4352_s15 = smov %s3998_s30 }
 0x671   : > { %s4353_s16 = smov %s3988_s12  ;;  %27 = sbr.rel (!%p25_p13) target bundleno = 10 (0xa), region = 134 }
 0x678   :  { %2655 = vsyncpa [#allocation3], 1 }
 0x679   :  { %2657 = vsyncpa [#allocation3 + $0x1], 1 }
 0x67a   :  { %2658 = vsyncpa [#allocation6], 1 }
 0x67b   :  { %2659 = vsyncpa [#allocation9], 1 }
 0x67c   :  { %2660 = vsyncpa [#allocation4], 1 }
 0x67d   :  { %2662 = vsyncpa [#allocation4 + $0x1], 1 }

</bundles_post_ra>
